<compile_context>
chip_gen: v7x
topology: tpu7x:2x2x1
jax: 0.10.0
libtpu: 0.0.40
codegen_flags: <defaults>
</compile_context>

<pallas_src>
import functools
import math

import jax
import jax.numpy as jnp
from jax.experimental import pallas as pl
from jax.experimental.pallas import tpu as pltpu


def mha_kernel(xq_ref, xk_ref, xv_ref,
               wqkv_ref, bqkv_ref, wo_ref, bo_ref, gamma_ref, beta_ref,
               out_ref, acc_ref,
               *, block_b, seq_len, d_model, h_block, num_h_steps, eps):
    g = pl.program_id(1)            # head-block index (reduction axis)

    @pl.when(g == 0)
    def _init():
        acc_ref[...] = jnp.zeros_like(acc_ref)

    f32, bf16 = jnp.float32, jnp.bfloat16
    D = d_model
    HBD = h_block * D
    R = block_b * seq_len
    scale = 1.0 / math.sqrt(D)

    # (block_b, S, D) -> (R, D): free leading-dim merge when S is a multiple of the
    # sublane tile (8 for f32, 16 for bf16); the demo uses S = 16.
    xq_f = xq_ref[...].reshape(R, D)          # f32, kept for the residual
    xq_b = xq_f.astype(bf16)
    xk_b = xk_ref[...].reshape(R, D)          # bf16
    xv_b = xv_ref[...].reshape(R, D)

    # Head-blocked projections (one wide-N matmul each); bias + scale + cast fused so the
    # f32 temporaries die immediately.  bf16 operands on the MXU, f32 accumulation.
    q = ((jnp.dot(xq_b, wqkv_ref[0, 0], preferred_element_type=f32)
          + bqkv_ref[0, 0]) * scale).astype(bf16)
    k = (jnp.dot(xk_b, wqkv_ref[0, 1], preferred_element_type=f32)
         + bqkv_ref[0, 1]).astype(bf16)
    v = (jnp.dot(xv_b, wqkv_ref[0, 2], preferred_element_type=f32)
         + bqkv_ref[0, 2]).astype(bf16)

    qb = q.reshape(block_b, seq_len, HBD)
    kb = k.reshape(block_b, seq_len, HBD)
    vb = v.reshape(block_b, seq_len, HBD)

    # Attention per head of this block (batched over the batch block); softmax in f32,
    # reciprocal on the EUP slot.
    ctx_heads = []
    for hh in range(h_block):
        sl = slice(hh * D, (hh + 1) * D)
        s = jnp.einsum('bqd,bkd->bqk', qb[:, :, sl], kb[:, :, sl],
                       preferred_element_type=f32)
        s = s - jnp.max(s, axis=-1, keepdims=True)
        e = jnp.exp(s)
        p = (e * pl.reciprocal(jnp.sum(e, axis=-1, keepdims=True),
                               approx=True)).astype(bf16)
        ctx_heads.append(jnp.einsum('bqk,bkd->bqd', p, vb[:, :, sl],
                                    preferred_element_type=f32))
    ctx = ctx_heads[0] if h_block == 1 else jnp.concatenate(ctx_heads, axis=-1)

    # Output projection for this head block, accumulated across the head axis:
    #   sum_g (ctx_g @ W_o[g])  ==  concat-heads @ W_o      (wide MXU K = h_block*D)
    acc_ref[...] += jnp.dot(ctx.reshape(R, HBD).astype(bf16), wo_ref[0],
                            preferred_element_type=f32)

    @pl.when(g == num_h_steps - 1)
    def _finalize():
        # bias + residual (original f32 input) + LayerNorm, all in f32.
        y = acc_ref[...] + bo_ref[...] + xq_f
        mean = jnp.mean(y, axis=-1, keepdims=True)
        var = jnp.mean(jnp.square(y - mean), axis=-1, keepdims=True)
        out = (y - mean) * jax.lax.rsqrt(var + eps) * gamma_ref[...] + beta_ref[...]
        out_ref[...] = out.reshape(block_b, seq_len, D).astype(out_ref.dtype)


def multi_head_attention(xq, xk, xv, params, *, num_heads, eps=1e-5,
                         block_b=None, h_block=None):
    B, S, D = xq.shape
    H = num_heads
    f32, bf16 = jnp.float32, jnp.bfloat16

    # --- head blocking: widen the per-step MXU N (h_block*D) and cut grid steps / DMAs.
    if h_block is None:
        target_n = max(D, 512)
        h_block = 1
        for cand in range(1, H + 1):
            if H % cand == 0 and cand * D <= target_n:
                h_block = cand
    assert H % h_block == 0
    num_h_steps = H // h_block
    HBD = h_block * D

    # --- batch blocking: fill MXU M, but keep >= 2 parallel steps (v7x has 2 TensorCores).
    if block_b is None:
        row_cap = 2048
        max_bb = B if B == 1 else max(1, B // 2)
        block_b = 1
        for cand in range(1, max_bb + 1):
            if B % cand == 0 and cand * S <= row_cap:
                block_b = cand
    assert B % block_b == 0

    # --- VMEM budget (bytes): double-buffered streamed blocks + scratch + in-kernel temps.
    def vmem_estimate(bb):
        r = bb * S
        act_in = 2 * (r * D * 4 + 2 * r * D * 2)                    # xq f32 + xk/xv bf16
        w_in = 2 * (3 * D * HBD * 2 + 3 * HBD * 4 + HBD * D * 2 + 3 * D * 4)
        out_b = 2 * r * D * 4
        scratch = r * D * 4
        temps = (3 * r * HBD * (4 + 2)                              # q/k/v f32 + bf16
                 + h_block * bb * S * S * (4 + 4 + 2)               # s, e (f32), p (bf16)
                 + r * HBD * (4 + 2)                                # ctx f32 + bf16
                 + 2 * r * D * 4)                                   # finalize temps
        return act_in + w_in + out_b + scratch + temps + (4 << 20)

    phys_vmem = 64 << 20                                            # conservative default (v7x)
    try:
        info = pltpu.get_tpu_info()
        phys_vmem = int(getattr(info, "vmem_capacity_bytes", phys_vmem))
    except Exception:
        pass
    cap = (phys_vmem * 3) // 4          # ~48 MiB on v7x (64 MiB), ~96 MiB on v5e/v6e (128 MiB)

    while block_b > 1 and vmem_estimate(block_b) > cap:
        block_b = max(d for d in range(1, block_b) if B % d == 0)
    nb = B // block_b
    R = block_b * S
    vmem_limit = int(min(max(vmem_estimate(block_b), 32 << 20), cap))

    # --- operand prep: residual stays f32; MXU operands bf16; weights fused per head block.
    xq_f = xq.astype(f32)
    xk_b = xk.astype(bf16)
    xv_b = xv.astype(bf16)

    # (D, H*D) column-head-major -> (num_h_steps, 3, D, h_block*D): one DMA per step.
    wq3 = params["wq_t"].reshape(D, num_h_steps, HBD)
    wk3 = params["wk_t"].reshape(D, num_h_steps, HBD)
    wv3 = params["wv_t"].reshape(D, num_h_steps, HBD)
    w_qkv = jnp.stack([wq3, wk3, wv3], axis=0).transpose(2, 0, 1, 3).astype(bf16)

    bq3 = params["bq"].reshape(num_h_steps, 1, HBD)
    bk3 = params["bk"].reshape(num_h_steps, 1, HBD)
    bv3 = params["bv"].reshape(num_h_steps, 1, HBD)
    b_qkv = jnp.stack([bq3, bk3, bv3], axis=1).astype(f32)          # (nh, 3, 1, HBD)

    wo = params["wo_t"].reshape(num_h_steps, HBD, D).astype(bf16)   # rows head-major
    bo = params["bo"].astype(f32)          # (1, D)
    gamma = params["gamma"].astype(f32)    # (1, D)
    beta = params["beta"].astype(f32)      # (1, D)

    kern = functools.partial(mha_kernel, block_b=block_b, seq_len=S, d_model=D,
                             h_block=h_block, num_h_steps=num_h_steps, eps=eps)

    act_spec = pl.BlockSpec((block_b, S, D), lambda b, g: (b, 0, 0))
    wqkv_spec = pl.BlockSpec((1, 3, D, HBD), lambda b, g: (g, 0, 0, 0))
    bqkv_spec = pl.BlockSpec((1, 3, 1, HBD), lambda b, g: (g, 0, 0, 0))
    wo_spec = pl.BlockSpec((1, HBD, D), lambda b, g: (g, 0, 0))
    vec_spec = pl.BlockSpec((1, D), lambda b, g: (0, 0))
    out_spec = pl.BlockSpec((block_b, S, D), lambda b, g: (b, 0, 0))

    return pl.pallas_call(
        kern,
        out_shape=jax.ShapeDtypeStruct((B, S, D), f32),
        grid=(nb, num_h_steps),
        in_specs=[act_spec, act_spec, act_spec,
                  wqkv_spec, bqkv_spec, wo_spec,
                  vec_spec, vec_spec, vec_spec],
        out_specs=out_spec,
        scratch_shapes=[pltpu.VMEM((R, D), jnp.float32)],
        compiler_params=pltpu.CompilerParams(
            dimension_semantics=("parallel", "arbitrary"),
            vmem_limit_bytes=vmem_limit),
    )(xq_f, xk_b, xv_b, w_qkv, b_qkv, wo, bo, gamma, beta)


def reference_mha(xq, xk, xv, params, *, num_heads, eps=1e-5):
    """Pure-JAX f32 reference mirroring the PyTorch module."""
    B, S, D = xq.shape
    H = num_heads
    q = xq @ params["wq_t"] + params["bq"][0]
    k = xk @ params["wk_t"] + params["bk"][0]
    v = xv @ params["wv_t"] + params["bv"][0]
    q = q.reshape(B, S, H, D).transpose(0, 2, 1, 3)
    k = k.reshape(B, S, H, D).transpose(0, 2, 1, 3)
    v = v.reshape(B, S, H, D).transpose(0, 2, 1, 3)
    scores = jnp.einsum("bhqd,bhkd->bhqk", q, k) / math.sqrt(D)
    attn = jax.nn.softmax(scores, axis=-1)
    ctx = jnp.einsum("bhqk,bhkd->bhqd", attn, v)
    ctx = ctx.transpose(0, 2, 1, 3).reshape(B, S, H * D)
    out = ctx @ params["wo_t"] + params["bo"][0]
    y = out + xq
    mean = jnp.mean(y, axis=-1, keepdims=True)
    var = jnp.mean((y - mean) ** 2, axis=-1, keepdims=True)
    return (y - mean) / jnp.sqrt(var + eps) * params["gamma"][0] + params["beta"][0]


def init_params(key, d_model, num_heads):
    HD = d_model * num_heads
    ks = jax.random.split(key, 8)
    scale_in = 1.0 / math.sqrt(d_model)
    scale_out = 1.0 / math.sqrt(HD)
    return {
        # weights stored as (in, out) == torch weight.T
        "wq_t": jax.random.uniform(ks[0], (d_model, HD), jnp.float32, -scale_in, scale_in),
        "wk_t": jax.random.uniform(ks[1], (d_model, HD), jnp.float32, -scale_in, scale_in),
        "wv_t": jax.random.uniform(ks[2], (d_model, HD), jnp.float32, -scale_in, scale_in),
        "wo_t": jax.random.uniform(ks[3], (HD, d_model), jnp.float32, -scale_out, scale_out),
        "bq": jax.random.uniform(ks[4], (1, HD), jnp.float32, -scale_in, scale_in),
        "bk": jax.random.uniform(ks[5], (1, HD), jnp.float32, -scale_in, scale_in),
        "bv": jax.random.uniform(ks[6], (1, HD), jnp.float32, -scale_in, scale_in),
        "bo": jax.random.uniform(ks[7], (1, d_model), jnp.float32, -scale_out, scale_out),
        "gamma": jnp.ones((1, d_model), jnp.float32),   # LayerNorm weight
        "beta": jnp.zeros((1, d_model), jnp.float32),   # LayerNorm bias
    }


if __name__ == "__main__":
    # S = 16 keeps the (block_b, S, D) -> (R, D) merge free for bf16 (sublane tile 16).
    B, S, d_model, num_heads = 2, 16, 32, 4

    key = jax.random.PRNGKey(0)
    k_params, k_q, k_k, k_v = jax.random.split(key, 4)
    params = init_params(k_params, d_model, num_heads)

    xq = jax.random.normal(k_q, (B, S, d_model), jnp.float32)
    xk = jax.random.normal(k_k, (B, S, d_model), jnp.float32)
    xv = jax.random.normal(k_v, (B, S, d_model), jnp.float32)

    out = multi_head_attention(xq, xk, xv, params, num_heads=num_heads)
    out = jax.block_until_ready(out)

    ref = reference_mha(xq, xk, xv, params, num_heads=num_heads)
    assert out.shape == (B, S, d_model)
    # bf16 MXU operands with f32 accumulation: relaxed tolerance vs the f32 reference.
    max_err = float(jnp.max(jnp.abs(out - ref)))
    assert jnp.allclose(out, ref, atol=5e-2, rtol=5e-2), \
        f"mismatch vs reference (max abs err {max_err})"

    print("KERNEL_OK")
</pallas_src>

<mosaic_0001>
module attributes {stable_mosaic.version = 11 : i64} {
  func.func @mha_kernel(%arg0: i32, %arg1: i32, %arg2: memref<1x16x32xf32, #tpu.memory_space<vmem>>, %arg3: memref<1x16x32xbf16, #tpu.memory_space<vmem>>, %arg4: memref<1x16x32xbf16, #tpu.memory_space<vmem>>, %arg5: memref<1x3x32x128xbf16, #tpu.memory_space<vmem>>, %arg6: memref<1x3x1x128xf32, #tpu.memory_space<vmem>>, %arg7: memref<1x128x32xbf16, #tpu.memory_space<vmem>>, %arg8: memref<1x32xf32, #tpu.memory_space<vmem>>, %arg9: memref<1x32xf32, #tpu.memory_space<vmem>>, %arg10: memref<1x32xf32, #tpu.memory_space<vmem>>, %arg11: memref<1x16x32xf32, #tpu.memory_space<vmem>>, %arg12: memref<16x32xf32, #tpu.memory_space<vmem>>) attributes {dimension_semantics = [#tpu.dimension_semantics<parallel>, #tpu.dimension_semantics<arbitrary>], iteration_bounds = array<i64: 2, 1>, scalar_prefetch = 0 : i64, scratch_operands = 1 : i64, tpu.core_type = #tpu.core_type<tc>, window_params = [{transform_indices = @transform_0, window_bounds = array<i64: 1, 16, 32>}, {transform_indices = @transform_1, window_bounds = array<i64: 1, 16, 32>}, {transform_indices = @transform_2, window_bounds = array<i64: 1, 16, 32>}, {transform_indices = @transform_3, window_bounds = array<i64: 1, 3, 32, 128>}, {transform_indices = @transform_4, window_bounds = array<i64: 1, 3, 1, 128>}, {transform_indices = @transform_5, window_bounds = array<i64: 1, 128, 32>}, {pipeline_mode = #tpu.pipeline_mode<synchronous>, transform_indices = @transform_6, window_bounds = array<i64: 1, 32>}, {pipeline_mode = #tpu.pipeline_mode<synchronous>, transform_indices = @transform_7, window_bounds = array<i64: 1, 32>}, {pipeline_mode = #tpu.pipeline_mode<synchronous>, transform_indices = @transform_8, window_bounds = array<i64: 1, 32>}, {transform_indices = @transform_9, window_bounds = array<i64: 1, 16, 32>}]} {
    %c0_i32 = arith.constant 0 : i32
    %0 = arith.cmpi eq, %arg1, %c0_i32 : i32
    %1 = arith.extui %0 : i1 to i32
    %c0_i32_0 = arith.constant 0 : i32
    %2 = arith.cmpi ne, %1, %c0_i32_0 : i32
    scf.if %2 {
      %cst_60 = arith.constant 0.000000e+00 : f32
      %115 = vector.broadcast %cst_60 : f32 to vector<16x32xf32>
      %c0_61 = arith.constant 0 : index
      %c0_62 = arith.constant 0 : index
      %116 = vector.load %arg12[%c0_61, %c0_62] : memref<16x32xf32, #tpu.memory_space<vmem>>, vector<16x32xf32>
      tpu.vector_store %arg12[%c0_61, %c0_62], %115 {strides = array<i32>} : memref<16x32xf32, #tpu.memory_space<vmem>>, vector<16x32xf32>,
    } else {
    }
    %c0 = arith.constant 0 : index
    %c0_1 = arith.constant 0 : index
    %c0_2 = arith.constant 0 : index
    %3 = vector.load %arg2[%c0, %c0_1, %c0_2] : memref<1x16x32xf32, #tpu.memory_space<vmem>>, vector<1x16x32xf32>
    %4 = vector.shape_cast %3 : vector<1x16x32xf32> to vector<16x32xf32>
    %5 = arith.truncf %4 : vector<16x32xf32> to vector<16x32xbf16>
    %c0_3 = arith.constant 0 : index
    %c0_4 = arith.constant 0 : index
    %c0_5 = arith.constant 0 : index
    %6 = vector.load %arg3[%c0_3, %c0_4, %c0_5] : memref<1x16x32xbf16, #tpu.memory_space<vmem>>, vector<1x16x32xbf16>
    %7 = vector.shape_cast %6 : vector<1x16x32xbf16> to vector<16x32xbf16>
    %c0_6 = arith.constant 0 : index
    %c0_7 = arith.constant 0 : index
    %c0_8 = arith.constant 0 : index
    %8 = vector.load %arg4[%c0_6, %c0_7, %c0_8] : memref<1x16x32xbf16, #tpu.memory_space<vmem>>, vector<1x16x32xbf16>
    %9 = vector.shape_cast %8 : vector<1x16x32xbf16> to vector<16x32xbf16>
    %c0_9 = arith.constant 0 : index
    %c0_10 = arith.constant 0 : index
    %c0_11 = arith.constant 0 : index
    %c0_12 = arith.constant 0 : index
    %10 = vector.load %arg5[%c0_9, %c0_10, %c0_11, %c0_12] : memref<1x3x32x128xbf16, #tpu.memory_space<vmem>>, vector<1x1x32x128xbf16>
    %11 = vector.shape_cast %10 : vector<1x1x32x128xbf16> to vector<32x128xbf16>
    %cst = arith.constant dense<0.000000e+00> : vector<16x128xf32>
    %12 = tpu.matmul %5, %11, %cst {dimension_numbers = #tpu.dot_dimension_numbers<[1], [0], [0], [1], [0, 0, 1, 1], [], []>} : vector<16x32xbf16>, vector<32x128xbf16>, vector<16x128xf32> -> vector<16x128xf32>
    %c0_13 = arith.constant 0 : index
    %c0_14 = arith.constant 0 : index
    %c0_15 = arith.constant 0 : index
    %c0_16 = arith.constant 0 : index
    %13 = vector.load %arg6[%c0_13, %c0_14, %c0_15, %c0_16] : memref<1x3x1x128xf32, #tpu.memory_space<vmem>>, vector<1x1x1x128xf32>
    %14 = vector.shape_cast %13 : vector<1x1x1x128xf32> to vector<1x128xf32>
    %15 = vector.broadcast %14 : vector<1x128xf32> to vector<16x128xf32>
    %16 = arith.addf %12, %15 : vector<16x128xf32>
    %cst_17 = arith.constant 0.176776692 : f32
    %17 = vector.broadcast %cst_17 : f32 to vector<16x128xf32>
    %18 = arith.mulf %16, %17 : vector<16x128xf32>
    %19 = arith.truncf %18 : vector<16x128xf32> to vector<16x128xbf16>
    %c0_18 = arith.constant 0 : index
    %c1 = arith.constant 1 : index
    %c0_19 = arith.constant 0 : index
    %c0_20 = arith.constant 0 : index
    %20 = vector.load %arg5[%c0_18, %c1, %c0_19, %c0_20] : memref<1x3x32x128xbf16, #tpu.memory_space<vmem>>, vector<1x1x32x128xbf16>
    %21 = vector.shape_cast %20 : vector<1x1x32x128xbf16> to vector<32x128xbf16>
    %cst_21 = arith.constant dense<0.000000e+00> : vector<16x128xf32>
    %22 = tpu.matmul %7, %21, %cst_21 {dimension_numbers = #tpu.dot_dimension_numbers<[1], [0], [0], [1], [0, 0, 1, 1], [], []>} : vector<16x32xbf16>, vector<32x128xbf16>, vector<16x128xf32> -> vector<16x128xf32>
    %c0_22 = arith.constant 0 : index
    %c1_23 = arith.constant 1 : index
    %c0_24 = arith.constant 0 : index
    %c0_25 = arith.constant 0 : index
    %23 = vector.load %arg6[%c0_22, %c1_23, %c0_24, %c0_25] : memref<1x3x1x128xf32, #tpu.memory_space<vmem>>, vector<1x1x1x128xf32>
    %24 = vector.shape_cast %23 : vector<1x1x1x128xf32> to vector<1x128xf32>
    %25 = vector.broadcast %24 : vector<1x128xf32> to vector<16x128xf32>
    %26 = arith.addf %22, %25 : vector<16x128xf32>
    %27 = arith.truncf %26 : vector<16x128xf32> to vector<16x128xbf16>
    %c0_26 = arith.constant 0 : index
    %c2 = arith.constant 2 : index
    %c0_27 = arith.constant 0 : index
    %c0_28 = arith.constant 0 : index
    %28 = vector.load %arg5[%c0_26, %c2, %c0_27, %c0_28] : memref<1x3x32x128xbf16, #tpu.memory_space<vmem>>, vector<1x1x32x128xbf16>
    %29 = vector.shape_cast %28 : vector<1x1x32x128xbf16> to vector<32x128xbf16>
    %cst_29 = arith.constant dense<0.000000e+00> : vector<16x128xf32>
    %30 = tpu.matmul %9, %29, %cst_29 {dimension_numbers = #tpu.dot_dimension_numbers<[1], [0], [0], [1], [0, 0, 1, 1], [], []>} : vector<16x32xbf16>, vector<32x128xbf16>, vector<16x128xf32> -> vector<16x128xf32>
    %c0_30 = arith.constant 0 : index
    %c2_31 = arith.constant 2 : index
    %c0_32 = arith.constant 0 : index
    %c0_33 = arith.constant 0 : index
    %31 = vector.load %arg6[%c0_30, %c2_31, %c0_32, %c0_33] : memref<1x3x1x128xf32, #tpu.memory_space<vmem>>, vector<1x1x1x128xf32>
    %32 = vector.shape_cast %31 : vector<1x1x1x128xf32> to vector<1x128xf32>
    %33 = vector.broadcast %32 : vector<1x128xf32> to vector<16x128xf32>
    %34 = arith.addf %30, %33 : vector<16x128xf32>
    %35 = arith.truncf %34 : vector<16x128xf32> to vector<16x128xbf16>
    %36 = vector.shape_cast %19 : vector<16x128xbf16> to vector<1x16x128xbf16>
    %37 = vector.shape_cast %27 : vector<16x128xbf16> to vector<1x16x128xbf16>
    %38 = vector.shape_cast %35 : vector<16x128xbf16> to vector<1x16x128xbf16>
    %39 = vector.extract_strided_slice %36 {offsets = [0, 0, 0], sizes = [1, 16, 32], strides = [1, 1, 1]} : vector<1x16x128xbf16> to vector<1x16x32xbf16>
    %40 = vector.extract_strided_slice %37 {offsets = [0, 0, 0], sizes = [1, 16, 32], strides = [1, 1, 1]} : vector<1x16x128xbf16> to vector<1x16x32xbf16>
    "tpu.trace_start"() <{level = 10 : i32, message = "bqd,bkd->bqk"}> : () -> ()
    %cst_34 = arith.constant dense<0.000000e+00> : vector<1x16x16xf32>
    %41 = tpu.matmul %39, %40, %cst_34 {dimension_numbers = #tpu.dot_dimension_numbers<[2], [2], [1], [1], [0, 0, 0, 1, 1, 1], [0], [0]>} : vector<1x16x32xbf16>, vector<1x16x32xbf16>, vector<1x16x16xf32> -> vector<1x16x16xf32>
    "tpu.trace_stop"() : () -> ()
    %cst_35 = arith.constant dense<0xFF800000> : vector<1x16xf32>
    %42 = vector.multi_reduction <maximumf>, %41, %cst_35 [2] : vector<1x16x16xf32> to vector<1x16xf32>
    %43 = vector.shape_cast %42 : vector<1x16xf32> to vector<1x16x1xf32>
    %44 = vector.broadcast %43 : vector<1x16x1xf32> to vector<1x16x16xf32>
    %45 = arith.subf %41, %44 : vector<1x16x16xf32>
    %46 = math.exp %45 : vector<1x16x16xf32>
    %cst_36 = arith.constant dense<0.000000e+00> : vector<1x16xf32>
    %47 = vector.multi_reduction <add>, %46, %cst_36 [2] : vector<1x16x16xf32> to vector<1x16xf32>
    %48 = vector.shape_cast %47 : vector<1x16xf32> to vector<1x16x1xf32>
    %49 = tpu.reciprocal %48 {approx = true} : vector<1x16x1xf32> -> vector<1x16x1xf32>
    %50 = vector.broadcast %49 : vector<1x16x1xf32> to vector<1x16x16xf32>
    %51 = arith.mulf %46, %50 : vector<1x16x16xf32>
    %52 = arith.truncf %51 : vector<1x16x16xf32> to vector<1x16x16xbf16>
    %53 = vector.extract_strided_slice %38 {offsets = [0, 0, 0], sizes = [1, 16, 32], strides = [1, 1, 1]} : vector<1x16x128xbf16> to vector<1x16x32xbf16>
    "tpu.trace_start"() <{level = 10 : i32, message = "bqk,bkd->bqd"}> : () -> ()
    %cst_37 = arith.constant dense<0.000000e+00> : vector<1x16x32xf32>
    %54 = tpu.matmul %52, %53, %cst_37 {dimension_numbers = #tpu.dot_dimension_numbers<[2], [1], [1], [2], [0, 0, 0, 1, 1, 2], [0], [0]>} : vector<1x16x16xbf16>, vector<1x16x32xbf16>, vector<1x16x32xf32> -> vector<1x16x32xf32>
    "tpu.trace_stop"() : () -> ()
    %55 = vector.extract_strided_slice %36 {offsets = [0, 0, 32], sizes = [1, 16, 32], strides = [1, 1, 1]} : vector<1x16x128xbf16> to vector<1x16x32xbf16>
    %56 = vector.extract_strided_slice %37 {offsets = [0, 0, 32], sizes = [1, 16, 32], strides = [1, 1, 1]} : vector<1x16x128xbf16> to vector<1x16x32xbf16>
    "tpu.trace_start"() <{level = 10 : i32, message = "bqd,bkd->bqk"}> : () -> ()
    %cst_38 = arith.constant dense<0.000000e+00> : vector<1x16x16xf32>
    %57 = tpu.matmul %55, %56, %cst_38 {dimension_numbers = #tpu.dot_dimension_numbers<[2], [2], [1], [1], [0, 0, 0, 1, 1, 1], [0], [0]>} : vector<1x16x32xbf16>, vector<1x16x32xbf16>, vector<1x16x16xf32> -> vector<1x16x16xf32>
    "tpu.trace_stop"() : () -> ()
    %cst_39 = arith.constant dense<0xFF800000> : vector<1x16xf32>
    %58 = vector.multi_reduction <maximumf>, %57, %cst_39 [2] : vector<1x16x16xf32> to vector<1x16xf32>
    %59 = vector.shape_cast %58 : vector<1x16xf32> to vector<1x16x1xf32>
    %60 = vector.broadcast %59 : vector<1x16x1xf32> to vector<1x16x16xf32>
    %61 = arith.subf %57, %60 : vector<1x16x16xf32>
    %62 = math.exp %61 : vector<1x16x16xf32>
    %cst_40 = arith.constant dense<0.000000e+00> : vector<1x16xf32>
    %63 = vector.multi_reduction <add>, %62, %cst_40 [2] : vector<1x16x16xf32> to vector<1x16xf32>
    %64 = vector.shape_cast %63 : vector<1x16xf32> to vector<1x16x1xf32>
    %65 = tpu.reciprocal %64 {approx = true} : vector<1x16x1xf32> -> vector<1x16x1xf32>
    %66 = vector.broadcast %65 : vector<1x16x1xf32> to vector<1x16x16xf32>
    %67 = arith.mulf %62, %66 : vector<1x16x16xf32>
    %68 = arith.truncf %67 : vector<1x16x16xf32> to vector<1x16x16xbf16>
    %69 = vector.extract_strided_slice %38 {offsets = [0, 0, 32], sizes = [1, 16, 32], strides = [1, 1, 1]} : vector<1x16x128xbf16> to vector<1x16x32xbf16>
    "tpu.trace_start"() <{level = 10 : i32, message = "bqk,bkd->bqd"}> : () -> ()
    %cst_41 = arith.constant dense<0.000000e+00> : vector<1x16x32xf32>
    %70 = tpu.matmul %68, %69, %cst_41 {dimension_numbers = #tpu.dot_dimension_numbers<[2], [1], [1], [2], [0, 0, 0, 1, 1, 2], [0], [0]>} : vector<1x16x16xbf16>, vector<1x16x32xbf16>, vector<1x16x32xf32> -> vector<1x16x32xf32>
    "tpu.trace_stop"() : () -> ()
    %71 = vector.extract_strided_slice %36 {offsets = [0, 0, 64], sizes = [1, 16, 32], strides = [1, 1, 1]} : vector<1x16x128xbf16> to vector<1x16x32xbf16>
    %72 = vector.extract_strided_slice %37 {offsets = [0, 0, 64], sizes = [1, 16, 32], strides = [1, 1, 1]} : vector<1x16x128xbf16> to vector<1x16x32xbf16>
    "tpu.trace_start"() <{level = 10 : i32, message = "bqd,bkd->bqk"}> : () -> ()
    %cst_42 = arith.constant dense<0.000000e+00> : vector<1x16x16xf32>
    %73 = tpu.matmul %71, %72, %cst_42 {dimension_numbers = #tpu.dot_dimension_numbers<[2], [2], [1], [1], [0, 0, 0, 1, 1, 1], [0], [0]>} : vector<1x16x32xbf16>, vector<1x16x32xbf16>, vector<1x16x16xf32> -> vector<1x16x16xf32>
    "tpu.trace_stop"() : () -> ()
    %cst_43 = arith.constant dense<0xFF800000> : vector<1x16xf32>
    %74 = vector.multi_reduction <maximumf>, %73, %cst_43 [2] : vector<1x16x16xf32> to vector<1x16xf32>
    %75 = vector.shape_cast %74 : vector<1x16xf32> to vector<1x16x1xf32>
    %76 = vector.broadcast %75 : vector<1x16x1xf32> to vector<1x16x16xf32>
    %77 = arith.subf %73, %76 : vector<1x16x16xf32>
    %78 = math.exp %77 : vector<1x16x16xf32>
    %cst_44 = arith.constant dense<0.000000e+00> : vector<1x16xf32>
    %79 = vector.multi_reduction <add>, %78, %cst_44 [2] : vector<1x16x16xf32> to vector<1x16xf32>
    %80 = vector.shape_cast %79 : vector<1x16xf32> to vector<1x16x1xf32>
    %81 = tpu.reciprocal %80 {approx = true} : vector<1x16x1xf32> -> vector<1x16x1xf32>
    %82 = vector.broadcast %81 : vector<1x16x1xf32> to vector<1x16x16xf32>
    %83 = arith.mulf %78, %82 : vector<1x16x16xf32>
    %84 = arith.truncf %83 : vector<1x16x16xf32> to vector<1x16x16xbf16>
    %85 = vector.extract_strided_slice %38 {offsets = [0, 0, 64], sizes = [1, 16, 32], strides = [1, 1, 1]} : vector<1x16x128xbf16> to vector<1x16x32xbf16>
    "tpu.trace_start"() <{level = 10 : i32, message = "bqk,bkd->bqd"}> : () -> ()
    %cst_45 = arith.constant dense<0.000000e+00> : vector<1x16x32xf32>
    %86 = tpu.matmul %84, %85, %cst_45 {dimension_numbers = #tpu.dot_dimension_numbers<[2], [1], [1], [2], [0, 0, 0, 1, 1, 2], [0], [0]>} : vector<1x16x16xbf16>, vector<1x16x32xbf16>, vector<1x16x32xf32> -> vector<1x16x32xf32>
    "tpu.trace_stop"() : () -> ()
    %87 = vector.extract_strided_slice %36 {offsets = [0, 0, 96], sizes = [1, 16, 32], strides = [1, 1, 1]} : vector<1x16x128xbf16> to vector<1x16x32xbf16>
    %88 = vector.extract_strided_slice %37 {offsets = [0, 0, 96], sizes = [1, 16, 32], strides = [1, 1, 1]} : vector<1x16x128xbf16> to vector<1x16x32xbf16>
    "tpu.trace_start"() <{level = 10 : i32, message = "bqd,bkd->bqk"}> : () -> ()
    %cst_46 = arith.constant dense<0.000000e+00> : vector<1x16x16xf32>
    %89 = tpu.matmul %87, %88, %cst_46 {dimension_numbers = #tpu.dot_dimension_numbers<[2], [2], [1], [1], [0, 0, 0, 1, 1, 1], [0], [0]>} : vector<1x16x32xbf16>, vector<1x16x32xbf16>, vector<1x16x16xf32> -> vector<1x16x16xf32>
    "tpu.trace_stop"() : () -> ()
    %cst_47 = arith.constant dense<0xFF800000> : vector<1x16xf32>
    %90 = vector.multi_reduction <maximumf>, %89, %cst_47 [2] : vector<1x16x16xf32> to vector<1x16xf32>
    %91 = vector.shape_cast %90 : vector<1x16xf32> to vector<1x16x1xf32>
    %92 = vector.broadcast %91 : vector<1x16x1xf32> to vector<1x16x16xf32>
    %93 = arith.subf %89, %92 : vector<1x16x16xf32>
    %94 = math.exp %93 : vector<1x16x16xf32>
    %cst_48 = arith.constant dense<0.000000e+00> : vector<1x16xf32>
    %95 = vector.multi_reduction <add>, %94, %cst_48 [2] : vector<1x16x16xf32> to vector<1x16xf32>
    %96 = vector.shape_cast %95 : vector<1x16xf32> to vector<1x16x1xf32>
    %97 = tpu.reciprocal %96 {approx = true} : vector<1x16x1xf32> -> vector<1x16x1xf32>
    %98 = vector.broadcast %97 : vector<1x16x1xf32> to vector<1x16x16xf32>
    %99 = arith.mulf %94, %98 : vector<1x16x16xf32>
    %100 = arith.truncf %99 : vector<1x16x16xf32> to vector<1x16x16xbf16>
    %101 = vector.extract_strided_slice %38 {offsets = [0, 0, 96], sizes = [1, 16, 32], strides = [1, 1, 1]} : vector<1x16x128xbf16> to vector<1x16x32xbf16>
    "tpu.trace_start"() <{level = 10 : i32, message = "bqk,bkd->bqd"}> : () -> ()
    %cst_49 = arith.constant dense<0.000000e+00> : vector<1x16x32xf32>
    %102 = tpu.matmul %100, %101, %cst_49 {dimension_numbers = #tpu.dot_dimension_numbers<[2], [1], [1], [2], [0, 0, 0, 1, 1, 2], [0], [0]>} : vector<1x16x16xbf16>, vector<1x16x32xbf16>, vector<1x16x32xf32> -> vector<1x16x32xf32>
    "tpu.trace_stop"() : () -> ()
    %103 = tpu.concatenate %54, %70, %86, %102 in 2 : vector<1x16x32xf32>, vector<1x16x32xf32>, vector<1x16x32xf32>, vector<1x16x32xf32> -> vector<1x16x128xf32>
    %c0_50 = arith.constant 0 : index
    %c0_51 = arith.constant 0 : index
    %104 = vector.load %arg12[%c0_50, %c0_51] : memref<16x32xf32, #tpu.memory_space<vmem>>, vector<16x32xf32>
    %105 = vector.shape_cast %103 : vector<1x16x128xf32> to vector<16x128xf32>
    %106 = arith.truncf %105 : vector<16x128xf32> to vector<16x128xbf16>
    %c0_52 = arith.constant 0 : index
    %c0_53 = arith.constant 0 : index
    %c0_54 = arith.constant 0 : index
    %107 = vector.load %arg7[%c0_52, %c0_53, %c0_54] : memref<1x128x32xbf16, #tpu.memory_space<vmem>>, vector<1x128x32xbf16>
    %108 = vector.shape_cast %107 : vector<1x128x32xbf16> to vector<128x32xbf16>
    %cst_55 = arith.constant dense<0.000000e+00> : vector<16x32xf32>
    %109 = tpu.matmul %106, %108, %cst_55 {dimension_numbers = #tpu.dot_dimension_numbers<[1], [0], [0], [1], [0, 0, 1, 1], [], []>} : vector<16x128xbf16>, vector<128x32xbf16>, vector<16x32xf32> -> vector<16x32xf32>
    %110 = arith.addf %104, %109 : vector<16x32xf32>
    %c0_56 = arith.constant 0 : index
    %c0_57 = arith.constant 0 : index
    %111 = vector.load %arg12[%c0_56, %c0_57] : memref<16x32xf32, #tpu.memory_space<vmem>>, vector<16x32xf32>
    tpu.vector_store %arg12[%c0_56, %c0_57], %110 {strides = array<i32>} : memref<16x32xf32, #tpu.memory_space<vmem>>, vector<16x32xf32>,
    %c0_i32_58 = arith.constant 0 : i32
    %112 = arith.cmpi eq, %arg1, %c0_i32_58 : i32
    %113 = arith.extui %112 : i1 to i32
    %c0_i32_59 = arith.constant 0 : i32
    %114 = arith.cmpi ne, %113, %c0_i32_59 : i32
    scf.if %114 {
      %c0_60 = arith.constant 0 : index
      %c0_61 = arith.constant 0 : index
      %115 = vector.load %arg12[%c0_60, %c0_61] : memref<16x32xf32, #tpu.memory_space<vmem>>, vector<16x32xf32>
      %c0_62 = arith.constant 0 : index
      %c0_63 = arith.constant 0 : index
      %116 = vector.load %arg8[%c0_62, %c0_63] : memref<1x32xf32, #tpu.memory_space<vmem>>, vector<1x32xf32>
      %117 = vector.broadcast %116 : vector<1x32xf32> to vector<16x32xf32>
      %118 = arith.addf %115, %117 : vector<16x32xf32>
      %119 = arith.addf %118, %4 : vector<16x32xf32>
      %cst_64 = arith.constant dense<0.000000e+00> : vector<16xf32>
      %120 = vector.multi_reduction <add>, %119, %cst_64 [1] : vector<16x32xf32> to vector<16xf32>
      %121 = vector.shape_cast %120 : vector<16xf32> to vector<16x1xf32>
      %cst_65 = arith.constant 3.200000e+01 : f32
      %122 = vector.broadcast %cst_65 : f32 to vector<16x1xf32>
      %123 = arith.divf %121, %122 : vector<16x1xf32>
      %124 = vector.broadcast %123 : vector<16x1xf32> to vector<16x32xf32>
      %125 = arith.subf %119, %124 : vector<16x32xf32>
      %126 = arith.mulf %125, %125 : vector<16x32xf32>
      %cst_66 = arith.constant dense<0.000000e+00> : vector<16xf32>
      %127 = vector.multi_reduction <add>, %126, %cst_66 [1] : vector<16x32xf32> to vector<16xf32>
      %128 = vector.shape_cast %127 : vector<16xf32> to vector<16x1xf32>
      %cst_67 = arith.constant 3.200000e+01 : f32
      %129 = vector.broadcast %cst_67 : f32 to vector<16x1xf32>
      %130 = arith.divf %128, %129 : vector<16x1xf32>
      %131 = vector.broadcast %123 : vector<16x1xf32> to vector<16x32xf32>
      %132 = arith.subf %119, %131 : vector<16x32xf32>
      %cst_68 = arith.constant 9.99999974E-6 : f32
      %133 = vector.broadcast %cst_68 : f32 to vector<16x1xf32>
      %134 = arith.addf %130, %133 : vector<16x1xf32>
      %135 = math.rsqrt %134 : vector<16x1xf32>
      %136 = vector.broadcast %135 : vector<16x1xf32> to vector<16x32xf32>
      %137 = arith.mulf %132, %136 : vector<16x32xf32>
      %c0_69 = arith.constant 0 : index
      %c0_70 = arith.constant 0 : index
      %138 = vector.load %arg9[%c0_69, %c0_70] : memref<1x32xf32, #tpu.memory_space<vmem>>, vector<1x32xf32>
      %139 = vector.broadcast %138 : vector<1x32xf32> to vector<16x32xf32>
      %140 = arith.mulf %137, %139 : vector<16x32xf32>
      %c0_71 = arith.constant 0 : index
      %c0_72 = arith.constant 0 : index
      %141 = vector.load %arg10[%c0_71, %c0_72] : memref<1x32xf32, #tpu.memory_space<vmem>>, vector<1x32xf32>
      %142 = vector.broadcast %141 : vector<1x32xf32> to vector<16x32xf32>
      %143 = arith.addf %140, %142 : vector<16x32xf32>
      %144 = vector.shape_cast %143 : vector<16x32xf32> to vector<1x16x32xf32>
      %c0_73 = arith.constant 0 : index
      %c0_74 = arith.constant 0 : index
      %c0_75 = arith.constant 0 : index
      %145 = vector.load %arg11[%c0_73, %c0_74, %c0_75] : memref<1x16x32xf32, #tpu.memory_space<vmem>>, vector<1x16x32xf32>
      tpu.vector_store %arg11[%c0_73, %c0_74, %c0_75], %144 {strides = array<i32>} : memref<1x16x32xf32, #tpu.memory_space<vmem>>, vector<1x16x32xf32>,
    } else {
    }
    return
  }
  func.func @transform_0(%arg0: i32, %arg1: i32) -> (i32, i32, i32) {
    %c0_i32 = arith.constant 0 : i32
    %c0_i32_0 = arith.constant 0 : i32
    %c0_i32_1 = arith.constant 0 : i32
    return %arg0, %c0_i32, %c0_i32_0 : i32, i32, i32
  }
  func.func @transform_1(%arg0: i32, %arg1: i32) -> (i32, i32, i32) {
    %c0_i32 = arith.constant 0 : i32
    %c0_i32_0 = arith.constant 0 : i32
    %c0_i32_1 = arith.constant 0 : i32
    return %arg0, %c0_i32, %c0_i32_0 : i32, i32, i32
  }
  func.func @transform_2(%arg0: i32, %arg1: i32) -> (i32, i32, i32) {
    %c0_i32 = arith.constant 0 : i32
    %c0_i32_0 = arith.constant 0 : i32
    %c0_i32_1 = arith.constant 0 : i32
    return %arg0, %c0_i32, %c0_i32_0 : i32, i32, i32
  }
  func.func @transform_3(%arg0: i32, %arg1: i32) -> (i32, i32, i32, i32) {
    %c0_i32 = arith.constant 0 : i32
    %c0_i32_0 = arith.constant 0 : i32
    %c0_i32_1 = arith.constant 0 : i32
    %c0_i32_2 = arith.constant 0 : i32
    return %arg1, %c0_i32, %c0_i32_0, %c0_i32_1 : i32, i32, i32, i32
  }
  func.func @transform_4(%arg0: i32, %arg1: i32) -> (i32, i32, i32, i32) {
    %c0_i32 = arith.constant 0 : i32
    %c0_i32_0 = arith.constant 0 : i32
    %c0_i32_1 = arith.constant 0 : i32
    %c0_i32_2 = arith.constant 0 : i32
    return %arg1, %c0_i32, %c0_i32_0, %c0_i32_1 : i32, i32, i32, i32
  }
  func.func @transform_5(%arg0: i32, %arg1: i32) -> (i32, i32, i32) {
    %c0_i32 = arith.constant 0 : i32
    %c0_i32_0 = arith.constant 0 : i32
    %c0_i32_1 = arith.constant 0 : i32
    return %arg1, %c0_i32, %c0_i32_0 : i32, i32, i32
  }
  func.func @transform_6(%arg0: i32, %arg1: i32) -> (i32, i32) {
    %c0_i32 = arith.constant 0 : i32
    %c0_i32_0 = arith.constant 0 : i32
    %c0_i32_1 = arith.constant 0 : i32
    return %c0_i32, %c0_i32_0 : i32, i32
  }
  func.func @transform_7(%arg0: i32, %arg1: i32) -> (i32, i32) {
    %c0_i32 = arith.constant 0 : i32
    %c0_i32_0 = arith.constant 0 : i32
    %c0_i32_1 = arith.constant 0 : i32
    return %c0_i32, %c0_i32_0 : i32, i32
  }
  func.func @transform_8(%arg0: i32, %arg1: i32) -> (i32, i32) {
    %c0_i32 = arith.constant 0 : i32
    %c0_i32_0 = arith.constant 0 : i32
    %c0_i32_1 = arith.constant 0 : i32
    return %c0_i32, %c0_i32_0 : i32, i32
  }
  func.func @transform_9(%arg0: i32, %arg1: i32) -> (i32, i32, i32) {
    %c0_i32 = arith.constant 0 : i32
    %c0_i32_0 = arith.constant 0 : i32
    %c0_i32_1 = arith.constant 0 : i32
    return %arg0, %c0_i32, %c0_i32_0 : i32, i32, i32
  }
}

</mosaic_0001>

<bundles_post_ra>
// kernel: tpu_custom_call.1
= control target key start
LH: loop header
LB: loop body
LE: loop exit
PB: predicated region body
PF: predicated region fallthrough
CT: control target
= control target key end

     0   :  { %s2625_s0 = inlined_call_operand.vmem [shape: f32[2,16,32], index: 0, kind: input, shape index: {}]   ;;  %s2626_s1 = inlined_call_operand.hbm [shape: bf16[2,16,32], index: 1, kind: input, shape index: {}]   ;;  %s2627_s2 = inlined_call_operand.hbm [shape: bf16[2,16,32], index: 2, kind: input, shape index: {}]   ;;  %s2628_s3 = inlined_call_operand.vmem [shape: bf16[1,3,32,128], index: 3, kind: input, shape index: {}]   ;;  %s2629_s4 = inlined_call_operand.hbm [shape: f32[1,3,1,128], index: 4, kind: input, shape index: {}]   ;;  %s2630_s5 = inlined_call_operand.vmem [shape: bf16[1,128,32], index: 5, kind: input, shape index: {}]   ;;  %s2631_s6 = inlined_call_operand.vmem [shape: f32[1,32], index: 6, kind: input, shape index: {}]   ;;  %s2632_s7 = inlined_call_operand.vmem [shape: f32[1,32], index: 7, kind: input, shape index: {}]   ;;  %s2633_s8 = inlined_call_operand.vmem [shape: f32[1,32], index: 8, kind: input, shape index: {}]   ;;  %s2634_s9 = inlined_call_operand.hbm [shape: f32[2,16,32], index: 9, kind: output, shape index: {}]  }
   0x1   :  { %2644 = sst [smem:[#allocation19_spill]] %s2626_s1 }
   0x2   :  { %2645 = sst [smem:[#allocation20_spill]] %s2629_s4 }
   0x3   :  { %2646 = sst [smem:[#allocation21_spill]] %s2634_s9 }
   0x4   :  { %14 = vsyncpa [#allocation4], 0 }
   0x5   :  { %16 = vsyncpa [#allocation4 + $0x1], 0 }
   0x6   :  { %17 = vsyncpa [#allocation7], 0 }
   0x7   :  { %19 = vsyncpa [#allocation7 + $0x1], 0 }
   0x8   :  { %20 = vsyncpa [#allocation5], 0 }
   0x9   :  { %22 = vsyncpa [#allocation5 + $0x1], 0  ;;  %s2177_s30 = smov 0   ;;  %s2179_s10 = smov 0  }
   0xa   :  { %s2181_s11 = smov 0   ;;  %s2183_s12 = smov 0  }
   0xb   :  { %s2185_s13 = smov 0   ;;  %s2187_s14 = smov 0  }
   0xc LB: > { %2647 = sst [smem:[#allocation14_spill]] %s2090_s30  ;;  %s2208_s15 = sadd.s32 4294967295, %s2110_s14   ;;  %s2110_s14 = sphi %s2187_s14, %s28_s14   ;;  %s2106_s13 = sphi %s2185_s13, %s2678_s13   ;;  %s2102_s12 = sphi %s2183_s12, %s2677_s12   ;;  %s2098_s11 = sphi %s2181_s11, %s2673_s11   ;;  %s2094_s10 = sphi %s2179_s10, %s2676_s10   ;;  %s2090_s30 = sphi %s2177_s30, %s2675_s30  }
   0xd   : > { %2648 = sst [smem:[#allocation15_spill]] %s2098_s11  ;;  %s1581_s16 = sadd.s32 4294967294, %s2110_s14  }
   0xe   : > { %p86_p0 = scmp.ne.s32.totalorder %s2094_s10, %s2090_s30  ;;  %p2635_p1 = scmp.eq.s32.totalorder %s2208_s15, 0 }
   0xf   : > { %p283_p3 = scmp.eq.s32.totalorder %s1581_s16, 1  ;;  %p1582_p5 = scmp.ge.s32.totalorder %s2110_s14, 1 }
  0x10   : > { %p2217_p4 = por %p2635_p1, %p86_p0  ;;  %p290_p7 = scmp.lt.s32.totalorder %s2110_s14, 3 }
  0x11   : > { %p2222_p6 = por %p283_p3, %p86_p0  ;;  %s2112_s20 = smov [#allocation8]  }
  0x12   : > { %s2649_s17 = scalar_select %p2217_p4, 1, 0 }
  0x13   : > { %s2650_s18 = scalar_select %p2222_p6, 1, 0 }
  0x14   : > { %p2227_p8 = pnand %p1582_p5, %p290_p7  ;;  %s313_s21 = sshll.u32 %s2112_s20, 4  ;;  %s314_s21 = int_to_ptr.vmem [resolvable:$true] %s313_s21 }
  0x15   : > { %2651 = sst [smem:[#allocation16_spill]] %s2650_s18  ;;  %s40_s23 = sadd.s32 1, %s2106_s13 }
  0x16   : > { %s2652_s19 = scalar_select %p2227_p8, 1, 0 }
  0x17   : > { %p1786_p9 = pneg %p2227_p8  ;;  %s2654_s4 = sld [smem:[#allocation20_spill]] }
  0x19   : > { %p2236_p11 = pnand %p1786_p9, %p2635_p1 }
  0x1b   : > { %p1934_p13 = pneg %p2236_p11 }
  0x1d   : > { %s1932_s26 = scalar_lea.hbm %s2654_s4, 48 }
  0x1e   : > { %p1933_p12 = scmp.ne.s32.totalorder %s2654_s4, %s1932_s26  ;;  %p1939_p5 = scmp.lt.u32.totalorder %s1932_s26, %s2654_s4 }
  0x20   : > { %p1935_p0 = pnand %p1934_p13, %p1933_p12 }
  0x22   : > { %p1936_p3 = pneg %p1935_p0 }
  0x24   : > { %p1941_p7 = pnand %p1939_p5, %p1936_p3 }
  0x26   : > { %1944 = shalt.err (!%p1941_p7)
}
  0x27   : > { %s1945_s20 = scalar_lea.vmem %s314_s21, 48  ;;  %s1952_s24 = scalar_lea.vmem %s314_s21, 64 }
  0x28   : > { %p1946_p9 = scmp.ne.s32.totalorder %s314_s21, %s1945_s20  ;;  %p1953_p2 = scmp.lt.s32.totalorder %s314_s21, %s314_s21 }
  0x29   : > { %p1954_p6 = scmp.lt.s32.totalorder %s1952_s24, %s1945_s20 }
  0x2a   : > { %p1948_p10 = pnand %p1946_p9, %p1934_p13 }
  0x2b   : > { %p1955_p4 = por %p1954_p6, %p1953_p2 }
  0x2c   : > { %p1949_p1 = pneg %p1948_p10 }
  0x2e   : > { %p1956_p8 = pnand %p1955_p4, %p1949_p1 }
  0x30   : > { %1959 = shalt.err (!%p1956_p8)
}
  0x31   : > { %s2113_s25 = smov 16   ;;  %s2114_s26 = smov 1  }
  0x32   : > { %1789 = dma.hbm_to_vmem [thread:$0]  (!%p2236_p11), %s2654_s4, 48, %s314_s21, [#allocation7], %s2113_s25, %s2113_s25, %s2114_s26  }
  0x33   : > { %p42_p1 = scmp.ge.s32.totalorder %s40_s23, 2  ;;  %s73_s29 = sadd.s32 1, %s2098_s11 }
  0x34   : > { %p80_p2 = scmp.ne.s32.totalorder %s2098_s11, %s2094_s10  ;;  %p81_p4 = scmp.eq.s32.totalorder %s2110_s14, 0 }
  0x35   : > { %s2680_s23 = smov (%p42_p1, %s40_s23), 0  ;;  %p2657_p8 = scmp.eq.s32.totalorder %s2208_s15, 1 }
  0x36   : > { %2655 = sst [smem:[#allocation17_spill]] %s2680_s23  ;;  %p2263_p6 = por %p81_p4, %p80_p2 }
  0x37   : > { %p2269_p10 = por %p2657_p8, %p80_p2  ;;  %s70_s20 = ssub.s32 %s2106_s13, %s2680_s23 }
  0x38   : > { %p1802_p12 = scmp.lt.s32.totalorder %s2110_s14, 2  ;;  %p71_p11 = scmp.eq.s32.totalorder %s70_s20, 0 }
  0x39   : > { %s352_s21 = sand.u32 1, %s2098_s11   ;;  %s2640_s26 = sshll.u32 %s2106_s13, 7 }
  0x3a   : > { %s2277_s24 = sshll.u32 %s352_s21, 3  ;;  %s2660_s1 = sld [smem:[#allocation19_spill]] }
  0x3b   : > { %s2280_s25 = scalar_select %p71_p11, %s2098_s11, %s73_s29  }
  0x3c   : > { %s356_s23 = scalar_lea.vmem [#allocation3], %s2277_s24  ;;  %p2295_p13 = pnand %p1802_p12, %p2263_p6 }
  0x3d   : > { %2659 = sst [smem:[#allocation18_spill]] %s2280_s25  ;;  %s363_s18 = sshll.u32 %s356_s23, 4  ;;  %s2291_s18 = int_to_ptr.vmem [resolvable:$true] %s363_s18 }
  0x3e   : > { %s2299_s29 = scalar_lea.sflag [#allocation4], %s352_s21  ;;  %p1962_p3 = pneg %p2295_p13 }
  0x40   : > { %s2288_s4 = scalar_lea.hbm %s2660_s1, %s2640_s26  ;;  %s1965_s16 = scalar_lea.hbm %s2660_s1, 256 }
  0x41   : > { %s1960_s27 = scalar_lea.hbm %s2288_s4, 128  ;;  %p1966_p9 = scmp.lt.u32.totalorder %s2288_s4, %s2660_s1 }
  0x42   : > { %p1961_p0 = scmp.ne.s32.totalorder %s2288_s4, %s1960_s27  ;;  %p1967_p1 = scmp.lt.u32.totalorder %s1965_s16, %s1960_s27 }
  0x43   : > { %p1969_p4 = scmp.lt.u32.totalorder %s1960_s27, %s2288_s4 }
  0x44   : > { %p1963_p5 = pnand %p1962_p3, %p1961_p0  ;;  %p1968_p2 = por %p1967_p1, %p1966_p9 }
  0x46   : > { %p1964_p7 = pneg %p1963_p5  ;;  %p1970_p6 = por %p1969_p4, %p1968_p2 }
  0x48   : > { %p1971_p8 = pnand %p1970_p6, %p1964_p7 }
  0x4a   : > { %1974 = shalt.err (!%p1971_p8)
}
  0x4b   : > { %s1975_s21 = scalar_lea.vmem %s2291_s18, 128  ;;  %s2115_s23 = smov [#allocation3]  }
  0x4c   : > { %p1976_p12 = scmp.ne.s32.totalorder %s2291_s18, %s1975_s21  ;;  %s1980_s28 = sshll.u32 %s2115_s23, 4  ;;  %s1981_s28 = int_to_ptr.vmem [resolvable:$false] %s1980_s28 }
  0x4d   : > { %s1982_s25 = scalar_lea.vmem %s1981_s28, 256  ;;  %p1983_p5 = scmp.lt.s32.totalorder %s2291_s18, %s1981_s28 }
  0x4e   : > { %p1978_p11 = pnand %p1976_p12, %p1962_p3  ;;  %p1984_p9 = scmp.lt.s32.totalorder %s1982_s25, %s1975_s21 }
  0x50   : > { %p1979_p0 = pneg %p1978_p11  ;;  %p1985_p1 = por %p1984_p9, %p1983_p5 }
  0x52   : > { %p1986_p2 = pnand %p1985_p1, %p1979_p0 }
  0x54   : > { %1989 = shalt.err (!%p1986_p2)
}
  0x55   : > { %s2116_s26 = smov 64   ;;  %s2117_s27 = smov 4  }
  0x56   : > { %1793 = dma.hbm_to_vmem [thread:$0]  (!%p2295_p13), %s2288_s4, 128, %s2291_s18, %s2299_s29, %s2116_s26, %s2116_s26, %s2117_s27  }
  0x57   : > { %s2662_s16 = sshll.u32 %s2106_s13, 7  ;;  %s377_s25 = scalar_lea.vmem [#allocation6], %s2277_s24 }
  0x58   : > { %s2335_s28 = scalar_lea.hbm %s2627_s2, %s2662_s16  ;;  %s384_s1 = sshll.u32 %s377_s25, 4  ;;  %s2338_s1 = int_to_ptr.vmem [resolvable:$true] %s384_s1 }
  0x59   : > { %s373_s11 = sand.u32 1, %s2110_s14   ;;  %s1990_s9 = scalar_lea.hbm %s2335_s28, 128 }
  0x5a   : > { %s2341_s30 = scalar_lea.sflag [#allocation7], %s373_s11  ;;  %p1991_p7 = scmp.ne.s32.totalorder %s2335_s28, %s1990_s9 }
  0x5b   : > { %s1995_s29 = scalar_lea.hbm %s2627_s2, 256  ;;  %p1996_p8 = scmp.lt.u32.totalorder %s2335_s28, %s2627_s2 }
  0x5c   : > { %p1993_p4 = pnand %p1991_p7, %p1962_p3  ;;  %p1997_p12 = scmp.lt.u32.totalorder %s1995_s29, %s1990_s9 }
  0x5d   : > { %p1999_p0 = scmp.lt.u32.totalorder %s1990_s9, %s2335_s28 }
  0x5e   : > { %p1994_p6 = pneg %p1993_p4  ;;  %p1998_p11 = por %p1997_p12, %p1996_p8 }
  0x60   : > { %p2000_p5 = por %p1999_p0, %p1998_p11 }
  0x62   : > { %p2001_p9 = pnand %p2000_p5, %p1994_p6 }
  0x64   : > { %2004 = shalt.err (!%p2001_p9)
}
  0x65   : > { %s2005_s11 = scalar_lea.vmem %s2338_s1, 128  ;;  %s2118_s24 = smov [#allocation6]  }
  0x66   : > { %p2006_p1 = scmp.ne.s32.totalorder %s2338_s1, %s2005_s11  ;;  %s2010_s23 = sshll.u32 %s2118_s24, 4  ;;  %s2011_s23 = int_to_ptr.vmem [resolvable:$false] %s2010_s23 }
  0x67   : > { %s2012_s25 = scalar_lea.vmem %s2011_s23, 256  ;;  %p2013_p4 = scmp.lt.s32.totalorder %s2338_s1, %s2011_s23 }
  0x68   : > { %p2008_p2 = pnand %p2006_p1, %p1962_p3  ;;  %p2014_p8 = scmp.lt.s32.totalorder %s2012_s25, %s2005_s11 }
  0x6a   : > { %p2009_p7 = pneg %p2008_p2  ;;  %p2015_p12 = por %p2014_p8, %p2013_p4 }
  0x6c   : > { %p2016_p11 = pnand %p2015_p12, %p2009_p7 }
  0x6e   : > { %2019 = shalt.err (!%p2016_p11)
}
  0x6f   : > { %1796 = dma.hbm_to_vmem [thread:$0]  (!%p2295_p13), %s2335_s28, 128, %s2338_s1, %s2341_s30, %s2116_s26, %s2116_s26, %s2117_s27  }
  0x70   : > { %p2663_p3 = scmp.ne.s32.totalorder %s2652_s19, 0 }
  0x71   : > { %s2373_s9 = sand.u32 (!%p2663_p3), 1, %s2094_s10   ;;  %p2664_p6 = scmp.ne.s32.totalorder (!%p2663_p3), %s2649_s17, 0 }
  0x72   : > { %396 = sbr.rel (%p2663_p3) target bundleno = 1929 (0x789), region = 56  ;;  %s1594_s4 = sshll.u32 (!%p2663_p3), %s2373_s9, 3 }
  0x73   : > { %s399_s18 = scalar_lea.sflag (!%p2663_p3), [#allocation4], %s2373_s9  ;;  %s2377_s29 = scalar_lea.vmem (!%p2663_p3), [#allocation3], %s1594_s4 }
  0x79   : > { %2073 = dma.done.wait (%p2664_p6), %s399_s18, 128  }
  0x7a   : > { %2075 = vsyncadd (%p2664_p6), %s399_s18, 4294967168  ;;  %s407_s1 = sand.u32 1, %s2208_s15   ;;  %s2384_s19 = scalar_lea.vmem [#allocation6], %s1594_s4 }
  0x7b   : > { %s408_s30 = scalar_lea.sflag [#allocation7], %s407_s1 }
  0x7c   : > { %2077 = dma.done.wait (%p2664_p6), %s408_s30, 128  }
  0x7d   : > { %2079 = vsyncadd (%p2664_p6), %s408_s30, 4294967168  ;;  %p2665_p13 = scmp.eq.s32.totalorder %s2208_s15, 0 }
  0x7f   : > { %2081 = dma.done.wait (%p2665_p13), [#allocation7], 48   ;;  %p2666_p0 = pmov %p2665_p13 }
  0x80   : > { %p470_p5 = scmp.lt.s32.totalorder %s2102_s12, 1  ;;  %vm490_vm0 = vcmask 261120   ;;  %v2119_v0 = vmov 0.0   ;;  %vm2120_vm1 = vmmov 0   ;;  %v1880_v1 = vld [vmem:[%s2628_s3] sm:$0xff]   ;;  %v1881_v2 = vld [vmem:[%s2628_s3 + $0x8] sm:$0xff]  }
  0x81   : > { %2083 = vsyncadd (%p2666_p0), [#allocation7], 4294967248  ;;  %1684 = vmatprep.subr.bf16.mxu0 %v2119_v0  ;;  %1688 = vmatprep.mubr.msk.bf16.mxu0 %vm2120_vm1, %v2119_v0  ;;  %491 = vst.msk [vmem:[#allocation2] sm:$0xff] %vm490_vm0, %v2119_v0  ;;  %v1882_v6 = vld [vmem:[%s2628_s3 + $0x10] sm:$0xff]   ;;  %v1883_v7 = vld [vmem:[%s2628_s3 + $0x18] sm:$0xff]   ;;  %s2121_s18 = smov 64  }
  0x82   : > { %492 = vst.msk [vmem:[#allocation2 + $0x8] sm:$0xff] %vm490_vm0, %v2119_v0  ;;  %s471_s17 = scalar_select %p470_p5, %s2102_s12, 1  ;;  %1708 = vmatprep.subr.bf16.mxu1 %v2119_v0  ;;  %1710 = vmatprep.mubr.msk.bf16.mxu1 %vm2120_vm1, %v2119_v0  ;;  %v1884_v8 = vld [vmem:[%s2377_s29] sm:$0xff]   ;;  %v1885_v28 = vld [vmem:[%s2628_s3 + $0x20] sm:$0xff]   ;;  %v1886_v29 = vld [vmem:[%s2628_s3 + $0x28] sm:$0xff]   ;;  %vm768_vm2 = vcmask 130048  }
  0x83   : > { %1685 = vmatpush3.bf16.msra.mxu0 %v1880_v1  ;;  %v1600_v9 = vld [vmem:[#allocation8] ss:$0 sm:$0xff]  ;;  %v1608_v19 = vld [vmem:[#allocation8 + $0x1] ss:$0 sm:$0xff]  ;;  %s2122_s29 = smov 96   ;;  %s2123_s1 = smov 32  }
  0x84   : > { %s1648_s15 = sshll.u32 %s471_s17, 4  ;;  %1686 = vmatprep.subr.bf16.mxu0 %v2119_v0  ;;  %v1887_v30 = vld [vmem:[%s2384_s19] sm:$0xff]   ;;  %v1617_v46 = vld [vmem:[#allocation8 + $0x2] ss:$0 sm:$0xff]  ;;  %vm1228_vm3 = vcmask 523264   ;;  %vm1231_vm4 = vcmask 785408  }
  0x85   : > { %s474_s27 = scalar_lea.vmem %s2625_s0, %s1648_s15  ;;  %s1649_s21 = sshll.u32 %s2102_s12, 8 }
  0x86   : > { %v2415_v3 = vld [vmem:[%s474_s27] sm:$0xff]  ;;  %v2417_v4 = vld [vmem:[%s474_s27 + $0x8] sm:$0xff]  ;;  %s1597_s27 = sshll.u32 %s2373_s9, 4  ;;  %s2667_s4 = sld [smem:[#allocation21_spill]] }
  0x87   : > { %v495_v5 = vpack.c.bf16 %v2417_v4, %v2415_v3  ;;  %1687 = vmatpush3.bf16.msra.mxu0 %v1881_v2  ;;  %s469_s11 = scalar_lea.vmem [#allocation9], %s1597_s27  ;;  %s1410_s17 = scalar_lea.sflag [#allocation5], %s2373_s9 }
  0x88   : > { %1692 = vmatprep.subr.bf16.mxu0 %v2119_v0  ;;  %s1423_s24 = sshll.u32 %s469_s11, 4  ;;  %s2124_s15 = smov [#allocation9]   ;;  %s2575_s24 = int_to_ptr.vmem [resolvable:$true] %s1423_s24 }
  0x89   : > { %s2020_s12 = scalar_lea.vmem %s2575_s24, 256  ;;  %s2024_s20 = sshll.u32 %s2124_s15, 4  ;;  %s2025_s20 = int_to_ptr.vmem [resolvable:$false] %s2024_s20 }
  0x8a   : > { %1689 = vmatmul.mubr.msk.bf16.vlgmr.msra.gmra.mrb[0].mxu0 %vm490_vm0, %v495_v5  ;;  %p2021_p9 = scmp.ne.s32.totalorder %s2575_s24, %s2020_s12  ;;  %s2026_s19 = scalar_lea.vmem %s2025_s20, 512 }
  0x8b   : > { %1693 = vmatpush3.bf16.msra.mxu0 %v1882_v6  ;;  %1696 = vmatprep.mubr.msk.bf16.mxu0 %vm2120_vm1, %v2119_v0  ;;  %p2027_p7 = scmp.lt.s32.totalorder %s2575_s24, %s2025_s20  ;;  %p2028_p4 = scmp.lt.s32.totalorder %s2026_s19, %s2020_s12 }
  0x8c   : > { %1694 = vmatprep.subr.bf16.mxu0 %v2119_v0  ;;  %s2573_s30 = scalar_lea.hbm %s2667_s4, %s1649_s21  ;;  %p2022_p1 = pnand %p2021_p9, %p2269_p10 }
  0x8d   : > { %p2029_p8 = por %p2028_p4, %p2027_p7 }
  0x8e   : > { %p2023_p2 = pneg %p2022_p1 }
  0x8f   : > { %1695 = vmatpush3.bf16.msra.mxu0 %v1883_v7 }
  0x90   : > { %1700 = vmatprep.subr.bf16.mxu0 %v2119_v0  ;;  %p2030_p12 = pnand %p2029_p8, %p2023_p2 }
  0x92   : > { %1697 = vmatmul.mubr.msk.bf16.vlgmr.msra.gmra.mrb[4].mxu0 %vm490_vm0, %v1884_v8 }
  0x93   : > { %1704 = vmatprep.mubr.msk.bf16.mxu0 %vm2120_vm1, %v2119_v0  ;;  %1701 = vmatpush3.bf16.msra.mxu0 %v1885_v28 }
  0x94   : > { %1702 = vmatprep.subr.bf16.mxu0 %v2119_v0 }
  0x97   : > { %1703 = vmatpush3.bf16.msra.mxu0 %v1886_v29 }
  0x98   : > { %1714 = vmatprep.subr.bf16.mxu0 %v2119_v0 }
  0x9a   : > { %1705 = vmatmul.mubr.msk.bf16.vlgmr.msra.gmra.mrb[8].mxu0 %vm490_vm0, %v1887_v30 }
  0x9b   : > { %1716 = vmatprep.mubr.msk.bf16.mxu0 %vm2120_vm1, %v2119_v0 }
 0x15d   : > { %v561_v10 = vpop.f32.mrb[0].mxu0 }
 0x15e   : > { %v562_v11 = vadd.f32 %v1600_v9, %v561_v10  ;;  %v1690_v12 = vpop.f32.mrb[1].mxu0 }
 0x15f   : > { %v564_v13 = vpop.f32.mrb[2].mxu0 }
 0x160   : > { %v565_v14 = vadd.f32 %v1600_v9, %v564_v13  ;;  %v1691_v15 = vpop.f32.mrb[3].mxu0  ;;  %v568_v16 = vmul.f32 0.17677669, %v562_v11 }
 0x162   : > { %v569_v17 = vmul.f32 0.17677669, %v565_v14 }
 0x164   : > { %v570_v18 = vpack.c.bf16 %v569_v17, %v568_v16 }
 0x165   : > { %v638_v20 = vpop.f32.mrb[4].mxu0 }
 0x166   : > { %v1698_v21 = vpop.f32.mrb[5].mxu0  ;;  %v639_v23 = vadd.f32 %v1608_v19, %v638_v20 }
 0x167   : > { %v641_v22 = vpop.f32.mrb[6].mxu0 }
 0x168   : > { %v642_v24 = vadd.f32 %v1608_v19, %v641_v22  ;;  %v1699_v25 = vpop.f32.mrb[7].mxu0 }
 0x16a   : > { %v645_v26 = vpack.c.bf16 %v642_v24, %v639_v23 }
 0x16c   : > { %962 = vrot.lane.b32.xlu1 %v645_v26, %s2121_s18  ;;  %840 = vrot.lane.b32.xlu0 %v645_v26, %s2122_s29  ;;  %v725_v27 = vsel %vm490_vm0, %v645_v26, 0 }
 0x16d   : > { %1709 = vmatpush3.bf16.xpose.msra.mxu1 %v725_v27  ;;  %v713_v47 = vpop.f32.mrb[8].mxu0 }
 0x16e   : > { %1720 = vmatprep.subr.bf16.mxu1 %v2119_v0  ;;  %v714_v48 = vadd.f32 %v1617_v46, %v713_v47  ;;  %v1706_v49 = vpop.f32.mrb[9].mxu0 }
 0x16f   : > { %v716_v50 = vpop.f32.mrb[10].mxu0 }
 0x170   : > { %960 = vrot.lane.b32.xlu1 %v570_v18, %s2121_s18  ;;  %837 = vrot.lane.b32.xlu0 %v570_v18, %s2122_s29  ;;  %v717_v51 = vadd.f32 %v1617_v46, %v716_v50  ;;  %v1707_v52 = vpop.f32.mrb[11].mxu0 }
 0x172   : > { %v2478_v53 = vpack.c.bf16 %v717_v51, %v714_v48 }
 0x174   : > { %1081 = vrot.lane.b32.xlu1 %v570_v18, %s2123_s1  ;;  %1083 = vrot.lane.b32.xlu0 %v645_v26, %s2123_s1 }
 0x175   : > { %1711 = vmatmul.mubr.msk.bf16.vlgmr.msra.gmra.mrb[0].mxu1 %vm490_vm0, %v570_v18  ;;  %1715 = vmatpush3.bf16.msra.mxu0 %v2478_v53 }
 0x176   : > { %1722 = vmatprep.mubr.msk.bf16.mxu1 %vm2120_vm1, %v2119_v0  ;;  %1726 = vmatprep.subr.bf16.mxu0 %v2119_v0 }
 0x1de   : > { %v841_v31 = vpop.permute.xlu0 %840  ;;  %v963_v33 = vpop.permute.xlu1 %962 }
 0x1df   : > { %v846_v32 = vsel %vm490_vm0, %v841_v31, 0  ;;  %v968_v35 = vsel %vm490_vm0, %v963_v33, 0 }
 0x1e0   : > { %1721 = vmatpush3.bf16.xpose.msra.mxu1 %v846_v32 }
 0x1e1   : > { %1732 = vmatprep.subr.bf16.mxu1 %v2119_v0 }
 0x1e2   : > { %v838_v34 = vpop.permute.xlu0 %837  ;;  %v961_v37 = vpop.permute.xlu1 %960 }
 0x1e6   : > { %v1084_v36 = vpop.permute.xlu0 %1083  ;;  %v1082_v39 = vpop.permute.xlu1 %1081 }
 0x1e7   : > { %1723 = vmatmul.mubr.msk.bf16.vlgmr.msra.gmra.mrb[4].mxu1 %vm490_vm0, %v838_v34  ;;  %v1089_v38 = vsel %vm490_vm0, %v1084_v36, 0 }
 0x1e8   : > { %1733 = vmatpush3.bf16.xpose.msra.mxu1 %v968_v35  ;;  %1734 = vmatprep.mubr.msk.bf16.mxu1 %vm2120_vm1, %v2119_v0 }
 0x1e9   : > { %1744 = vmatprep.subr.bf16.mxu1 %v2119_v0 }
 0x1ef   : > { %1735 = vmatmul.mubr.msk.bf16.vlgmr.msra.gmra.mrb[8].mxu1 %vm490_vm0, %v961_v37 }
 0x1f0   : > { %1745 = vmatpush3.bf16.xpose.msra.mxu1 %v1089_v38  ;;  %1746 = vmatprep.mubr.msk.bf16.mxu1 %vm2120_vm1, %v2119_v0 }
 0x1f1   : > { %1756 = vmatprep.subr.bf16.mxu1 %v2119_v0 }
 0x1f7   : > { %1747 = vmatmul.mubr.msk.bf16.vlgmr.msra.gmra.mrb[12].mxu1 %vm490_vm0, %v1082_v39 }
 0x1f8   : > { %1772 = vmatprep.mubr.msk.bf16.mxu1 %vm2120_vm1, %v2119_v0 }
 0x248   : > { %v761_v40 = vpop.f32.mrb[0].mxu1 }
 0x249   : > { %v1712_v41 = vpop.f32.mrb[1].mxu1  ;;  %v769_v42 = vsel %vm768_vm2, %v761_v40, -inf }
 0x24a   : > { %770 = vmax.xlane.f32.xlu0 %v769_v42  ;;  %v764_v43 = vpop.f32.mrb[2].mxu1 }
 0x24b   : > { %v1713_v44 = vpop.f32.mrb[3].mxu1  ;;  %v772_v45 = vsel %vm768_vm2, %v764_v43, -inf }
 0x24c   : > { %773 = vmax.xlane.f32.xlu1 %v772_v45 }
 0x2ba   : > { %v882_v54 = vpop.f32.mrb[4].mxu1 }
 0x2bb   : > { %v1724_v55 = vpop.f32.mrb[5].mxu1  ;;  %v889_v56 = vsel %vm768_vm2, %v882_v54, -inf }
 0x2bc   : > { %890 = vmax.xlane.f32.xlu0 %v889_v56  ;;  %v885_v57 = vpop.f32.mrb[6].mxu1 }
 0x2bd   : > { %v1725_v58 = vpop.f32.mrb[7].mxu1  ;;  %v892_v59 = vsel %vm768_vm2, %v885_v57, -inf }
 0x2c0   : > { %893 = vmax.xlane.f32.xlu0 %v892_v59 }
 0x2c2   : > { %v1004_v60 = vpop.f32.mrb[8].mxu1 }
 0x2c3   : > { %v1736_v61 = vpop.f32.mrb[9].mxu1  ;;  %v1011_v62 = vsel %vm768_vm2, %v1004_v60, -inf }
 0x2c4   : > { %1012 = vmax.xlane.f32.xlu1 %v1011_v62  ;;  %v1007_v63 = vpop.f32.mrb[10].mxu1 }
 0x2c5   : > { %v1737_v1 = vpop.f32.mrb[11].mxu1  ;;  %v1014_v2 = vsel %vm768_vm2, %v1007_v63, -inf }
 0x2c6   : > { %1015 = vmax.xlane.f32.xlu0 %v1014_v2 }
 0x2ca   : > { %v1125_v5 = vpop.f32.mrb[12].mxu1 }
 0x2cb   : > { %v1748_v6 = vpop.f32.mrb[13].mxu1  ;;  %v1132_v7 = vsel %vm768_vm2, %v1125_v5, -inf }
 0x2cc   : > { %1133 = vmax.xlane.f32.xlu1 %v1132_v7  ;;  %v1128_v8 = vpop.f32.mrb[14].mxu1 }
 0x2cd   : > { %v1749_v9 = vpop.f32.mrb[15].mxu1  ;;  %v1135_v10 = vsel %vm768_vm2, %v1128_v8, -inf }
 0x2ce   : > { %1136 = vmax.xlane.f32.xlu0 %v1135_v10 }
 0x2d7   : > { %v771_v11 = vpop.xlane.xlu0 %770 }
 0x2d8   : > { %v775_v12 = vsub.f32 %v761_v40, %v771_v11 }
 0x2d9   : > { %v774_v13 = vpop.xlane.xlu1 %773 }
 0x2da   : > { %v777_v14 = vmul.f32 1.442695, %v775_v12  ;;  %v776_v15 = vsub.f32 %v764_v43, %v774_v13 }
 0x2dc   : > { %1896 = vpow2.f32 %v777_v14  ;;  %v779_v16 = vmul.f32 1.442695, %v776_v15 }
 0x2de   : > { %1898 = vpow2.f32 %v779_v16 }
 0x2e6   : > { %v1897_v17 = vpop.eup %1896 }
 0x2e7   : > { %v781_v18 = vsel %vm768_vm2, %v1897_v17, 0.0 }
 0x2e8   : > { %v1899_v19 = vpop.eup %1898  ;;  %782 = vadd.xlane.f32.xlu1 %v781_v18 }
 0x2e9   : > { %v784_v20 = vsel %vm768_vm2, %v1899_v19, 0.0 }
 0x2ea   : > { %785 = vadd.xlane.f32.xlu0 %v784_v20 }
 0x2f9   : > { %913 = vrot.lane.b32.xlu1 %v2478_v53, %s2122_s29 }
 0x349   : > { %v891_v21 = vpop.xlane.xlu0 %890 }
 0x34a   : > { %v895_v22 = vsub.f32 %v882_v54, %v891_v21 }
 0x34c   : > { %v897_v23 = vmul.f32 1.442695, %v895_v22 }
 0x34d   : > { %v894_v24 = vpop.xlane.xlu0 %893 }
 0x34e   : > { %1900 = vpow2.f32 %v897_v23  ;;  %v896_v25 = vsub.f32 %v885_v57, %v894_v24 }
 0x350   : > { %v899_v26 = vmul.f32 1.442695, %v896_v25  ;;  %v1888_v25 = vld [vmem:[%s2630_s5] sm:$0xff]  }
 0x351   : > { %v1013_v27 = vpop.xlane.xlu1 %1012  ;;  %1757 = vmatpush3.bf16.msra.mxu1 %v1888_v25 }
 0x352   : > { %1902 = vpow2.f32 %v899_v26  ;;  %v1017_v28 = vsub.f32 %v1004_v60, %v1013_v27  ;;  %v1889_v26 = vld [vmem:[%s2630_s5 + $0x8] sm:$0xff]   ;;  %1758 = vmatprep.subr.bf16.mxu1 %v2119_v0  ;;  %v1890_v27 = vld [vmem:[%s2630_s5 + $0x10] sm:$0xff]  }
 0x353   : > { %v1016_v29 = vpop.xlane.xlu0 %1015 }
 0x354   : > { %v1019_v30 = vmul.f32 1.442695, %v1017_v28  ;;  %v1018_v31 = vsub.f32 %v1007_v63, %v1016_v29  ;;  %v1891_v28 = vld [vmem:[%s2630_s5 + $0x18] sm:$0xff]   ;;  %v1892_v29 = vld [vmem:[%s2630_s5 + $0x20] sm:$0xff]  }
 0x355   : > { %1759 = vmatpush3.bf16.msra.mxu1 %v1889_v26 }
 0x356   : > { %1904 = vpow2.f32 %v1019_v30  ;;  %v1021_v32 = vmul.f32 1.442695, %v1018_v31  ;;  %1760 = vmatprep.subr.bf16.mxu1 %v2119_v0 }
 0x358   : > { %v1901_v33 = vpop.eup %1900  ;;  %1906 = vpow2.f32 %v1021_v32  ;;  %v1893_v32 = vld [vmem:[%s2630_s5 + $0x28] sm:$0xff]  }
 0x359   : > { %v1134_v34 = vpop.xlane.xlu1 %1133  ;;  %v901_v35 = vsel %vm768_vm2, %v1901_v33, 0.0  ;;  %1761 = vmatpush3.bf16.msra.mxu1 %v1890_v27 }
 0x35a   : > { %v1138_v36 = vsub.f32 %v1125_v5, %v1134_v34  ;;  %902 = vadd.xlane.f32.xlu1 %v901_v35  ;;  %1762 = vmatprep.subr.bf16.mxu1 %v2119_v0 }
 0x35b   : > { %v1137_v37 = vpop.xlane.xlu0 %1136 }
 0x35c   : > { %v1903_v38 = vpop.eup %1902  ;;  %v1140_v39 = vmul.f32 1.442695, %v1138_v36  ;;  %v1139_v40 = vsub.f32 %v1128_v8, %v1137_v37  ;;  %v1894_v36 = vld [vmem:[%s2630_s5 + $0x30] sm:$0xff]  }
 0x35d   : > { %v904_v41 = vsel %vm768_vm2, %v1903_v38, 0.0  ;;  %1763 = vmatpush3.bf16.msra.mxu1 %v1891_v28 }
 0x35e   : > { %1908 = vpow2.f32 %v1140_v39  ;;  %v1142_v42 = vmul.f32 1.442695, %v1139_v40  ;;  %905 = vadd.xlane.f32.xlu0 %v904_v41  ;;  %1764 = vmatprep.subr.bf16.mxu1 %v2119_v0  ;;  %v1895_v39 = vld [vmem:[%s2630_s5 + $0x38] sm:$0xff]  }
 0x360   : > { %v1905_v43 = vpop.eup %1904  ;;  %1910 = vpow2.f32 %v1142_v42 }
 0x361   : > { %v1023_v44 = vsel %vm768_vm2, %v1905_v43, 0.0  ;;  %1765 = vmatpush3.bf16.msra.mxu1 %v1892_v29 }
 0x362   : > { %v1907_v45 = vpop.eup %1906  ;;  %1024 = vadd.xlane.f32.xlu1 %v1023_v44  ;;  %1766 = vmatprep.subr.bf16.mxu1 %v2119_v0 }
 0x363   : > { %v1026_v46 = vsel %vm768_vm2, %v1907_v45, 0.0 }
 0x364   : > { %1027 = vadd.xlane.f32.xlu0 %v1026_v46 }
 0x365   : > { %1767 = vmatpush3.bf16.msra.mxu1 %v1893_v32 }
 0x366   : > { %1768 = vmatprep.subr.bf16.mxu1 %v2119_v0 }
 0x368   : > { %v1909_v47 = vpop.eup %1908 }
 0x369   : > { %v1144_v48 = vsel %vm768_vm2, %v1909_v47, 0.0  ;;  %1769 = vmatpush3.bf16.msra.mxu1 %v1894_v36  ;;  %v1640_v36 = vld [vmem:[%s2633_s8] ss:$0 sm:$0xff] }
 0x36a   : > { %v1911_v49 = vpop.eup %1910  ;;  %1145 = vadd.xlane.f32.xlu1 %v1144_v48  ;;  %1770 = vmatprep.subr.bf16.mxu1 %v2119_v0 }
 0x36b   : > { %v1147_v50 = vsel %vm768_vm2, %v1911_v49, 0.0 }
 0x36c   : > { %1148 = vadd.xlane.f32.xlu0 %v1147_v50 }
 0x36d   : > { %1771 = vmatpush3.bf16.msra.mxu1 %v1895_v39 }
 0x375   : > { %v783_v51 = vpop.xlane.xlu1 %782 }
 0x376   : > { %1912 = vrcp.f32 %v783_v51 }
 0x377   : > { %v786_v52 = vpop.xlane.xlu0 %785 }
 0x378   : > { %1914 = vrcp.f32 %v786_v52 }
 0x379   : > { %v914_v59 = vpop.permute.xlu1 %913 }
 0x37b   : > { %1155 = vrot.lane.b32.xlu1 %v2478_v53, %s2123_s1 }
 0x380   : > { %v1913_v54 = vpop.eup %1912 }
 0x381   : > { %v789_v56 = vmul.f32 %v1913_v54, %v1897_v17 }
 0x382   : > { %v1915_v55 = vpop.eup %1914  ;;  %1034 = vrot.lane.b32.xlu0 %v2478_v53, %s2121_s18 }
 0x383   : > { %v790_v57 = vmul.f32 %v1915_v55, %v1899_v19 }
 0x385   : > { %v791_v58 = vpack.c.bf16 %v790_v57, %v789_v56 }
 0x387   : > { %1717 = vmatmul.mubr.msk.bf16.vlgmr.msra.gmra.mrb[12].mxu0 %vm768_vm2, %v791_v58 }
 0x388   : > { %1727 = vmatpush3.bf16.msra.mxu0 %v914_v59  ;;  %1728 = vmatprep.mubr.msk.bf16.mxu0 %vm2120_vm1, %v2119_v0 }
 0x389   : > { %1738 = vmatprep.subr.bf16.mxu0 %v2119_v0 }
 0x3e7   : > { %v903_v60 = vpop.xlane.xlu1 %902 }
 0x3e8   : > { %1916 = vrcp.f32 %v903_v60 }
 0x3eb   : > { %v906_v61 = vpop.xlane.xlu0 %905 }
 0x3ec   : > { %1918 = vrcp.f32 %v906_v61 }
 0x3ef   : > { %v1025_v62 = vpop.xlane.xlu1 %1024 }
 0x3f0   : > { %1920 = vrcp.f32 %v1025_v62 }
 0x3f1   : > { %v1028_v63 = vpop.xlane.xlu0 %1027 }
 0x3f2   : > { %1922 = vrcp.f32 %v1028_v63  ;;  %v1917_v53 = vpop.eup %1916 }
 0x3f3   : > { %v909_v2 = vmul.f32 %v1917_v53, %v1901_v33  ;;  %v1234_v53 = vld [vmem:[#allocation2] sm:$0xff] }
 0x3f6   : > { %v1919_v1 = vpop.eup %1918 }
 0x3f7   : > { %v910_v5 = vmul.f32 %v1919_v1, %v1903_v38  ;;  %v1146_v6 = vpop.xlane.xlu1 %1145 }
 0x3f8   : > { %1924 = vrcp.f32 %v1146_v6 }
 0x3f9   : > { %v1149_v7 = vpop.xlane.xlu0 %1148  ;;  %v911_v8 = vpack.c.bf16 %v910_v5, %v909_v2  ;;  %v1235_v2 = vld [vmem:[#allocation2 + $0x8] sm:$0xff] }
 0x3fa   : > { %1926 = vrcp.f32 %v1149_v7  ;;  %v1921_v9 = vpop.eup %1920 }
 0x3fb   : > { %1729 = vmatmul.mubr.msk.bf16.vlgmr.msra.gmra.mrb[16].mxu0 %vm768_vm2, %v911_v8  ;;  %v1031_v13 = vmul.f32 %v1921_v9, %v1905_v43  ;;  %v1156_v16 = vpop.permute.xlu1 %1155 }
 0x3fc   : > { %v1923_v10 = vpop.eup %1922  ;;  %1740 = vmatprep.mubr.msk.bf16.mxu0 %vm2120_vm1, %v2119_v0 }
 0x3fd   : > { %v1032_v11 = vmul.f32 %v1923_v10, %v1907_v45  ;;  %v1035_v12 = vpop.permute.xlu0 %1034  ;;  %v1638_v10 = vld [vmem:[%s2631_s6] ss:$0 sm:$0xff] }
 0x3fe   : > { %1739 = vmatpush3.bf16.msra.mxu0 %v1035_v12 }
 0x3ff   : > { %1750 = vmatprep.subr.bf16.mxu0 %v2119_v0  ;;  %v1033_v14 = vpack.c.bf16 %v1032_v11, %v1031_v13 }
 0x402   : > { %v1925_v15 = vpop.eup %1924 }
 0x403   : > { %1741 = vmatmul.mubr.msk.bf16.vlgmr.msra.gmra.mrb[20].mxu0 %vm768_vm2, %v1033_v14  ;;  %v1152_v19 = vmul.f32 %v1925_v15, %v1909_v47 }
 0x404   : > { %v1927_v17 = vpop.eup %1926  ;;  %1751 = vmatpush3.bf16.msra.mxu0 %v1156_v16  ;;  %1752 = vmatprep.mubr.msk.bf16.mxu0 %vm2120_vm1, %v2119_v0 }
 0x405   : > { %v1153_v18 = vmul.f32 %v1927_v17, %v1911_v49 }
 0x407   : > { %v1154_v20 = vpack.c.bf16 %v1153_v18, %v1152_v19 }
 0x40b   : > { %1753 = vmatmul.mubr.msk.bf16.vlgmr.msra.gmra.mrb[24].mxu0 %vm768_vm2, %v1154_v20 }
 0x45a   : > { %v829_v21 = vpop.f32.mrb[12].mxu0 }
 0x45b   : > { %v1718_v22 = vpop.f32.mrb[13].mxu0 }
 0x45c   : > { %v832_v23 = vpop.f32.mrb[14].mxu0 }
 0x45d   : > { %v1719_v24 = vpop.f32.mrb[15].mxu0 }
 0x4ce   : > { %v953_v30 = vpop.f32.mrb[16].mxu0 }
 0x4cf   : > { %v1730_v31 = vpop.f32.mrb[17].mxu0 }
 0x4d0   : > { %v956_v33 = vpop.f32.mrb[18].mxu0 }
 0x4d1   : > { %v1865_v34 = vpack.i.bf16 %v956_v33, %v953_v30  ;;  %v1731_v35 = vpop.f32.mrb[19].mxu0 }
 0x4d3   : > { %1866 = vrot.lane.b32.xlu1 %v1865_v34, %s2123_s1  ;;  %v1639_v34 = vld [vmem:[%s2632_s7] ss:$0 sm:$0xff] }
 0x4d6   : > { %v1074_v37 = vpop.f32.mrb[20].mxu0 }
 0x4d7   : > { %v1742_v38 = vpop.f32.mrb[21].mxu0 }
 0x4d8   : > { %v1077_v40 = vpop.f32.mrb[22].mxu0 }
 0x4d9   : > { %v1870_v41 = vpack.i.bf16 %v1077_v40, %v1074_v37  ;;  %v1743_v42 = vpop.f32.mrb[23].mxu0 }
 0x4db   : > { %1871 = vrot.lane.b32.xlu0 %v1870_v41, %s2121_s18 }
 0x4de   : > { %v1195_v43 = vpop.f32.mrb[24].mxu0 }
 0x4df   : > { %v1754_v44 = vpop.f32.mrb[25].mxu0 }
 0x4e0   : > { %v1198_v45 = vpop.f32.mrb[26].mxu0 }
 0x4e1   : > { %v1875_v46 = vpack.i.bf16 %v1198_v45, %v1195_v43  ;;  %v1755_v47 = vpop.f32.mrb[27].mxu0 }
 0x4e3   : > { %1876 = vrot.lane.b32.xlu1 %v1875_v46, %s2122_s29 }
 0x545   : > { %v1867_v48 = vpop.permute.xlu1 %1866 }
 0x546   : > { %v1869_v49 = vunpack.i.h.bf16 %v1867_v48  ;;  %v1868_v50 = vunpack.i.l.bf16 %v1867_v48 }
 0x548   : > { %v1227_v55 = vsel %vm490_vm0, %v832_v23, %v1869_v49  ;;  %v1226_v56 = vsel %vm490_vm0, %v829_v21, %v1868_v50 }
 0x54d   : > { %v1872_v0 = vpop.permute.xlu0 %1871 }
 0x54e   : > { %v1874_v51 = vunpack.i.h.bf16 %v1872_v0  ;;  %v1873_v52 = vunpack.i.l.bf16 %v1872_v0 }
 0x550   : > { %v1230_v59 = vsel %vm1228_vm3, %v1227_v55, %v1874_v51  ;;  %v1229_v60 = vsel %vm1228_vm3, %v1226_v56, %v1873_v52 }
 0x555   : > { %v1877_v54 = vpop.permute.xlu1 %1876 }
 0x556   : > { %v1879_v57 = vunpack.i.h.bf16 %v1877_v54  ;;  %v1878_v58 = vunpack.i.l.bf16 %v1877_v54 }
 0x558   : > { %v1233_v61 = vsel %vm1231_vm4, %v1230_v59, %v1879_v57  ;;  %v1232_v62 = vsel %vm1231_vm4, %v1229_v60, %v1878_v58 }
 0x559   : > { %v1236_v63 = vpack.c.bf16 %v1233_v61, %v1232_v62 }
 0x55b   : > { %1773 = vmatmul.mubr.bf16.vlgmr.msra.gmra.mrb[16].mxu1 %v1236_v63 }
 0x62e   : > { %v1335_v1 = vpop.f32.mrb[16].mxu1 }
 0x62f   : > { %v1342_v5 = vadd.f32 %v1335_v1, %v1234_v53  ;;  %v1774_v6 = vpop.f32.mrb[17].mxu1 }
 0x630   : > { %v1338_v7 = vpop.f32.mrb[18].mxu1 }
 0x631   : > { %1344 = vst.msk [vmem:[#allocation2] sm:$0xff] %vm490_vm0, %v1342_v5  ;;  %v1343_v8 = vadd.f32 %v1338_v7, %v1235_v2  ;;  %v1775_v9 = vpop.f32.mrb[19].mxu1 }
 0x633   : > { %1345 = vst.msk [vmem:[#allocation2 + $0x8] sm:$0xff] %vm490_vm0, %v1343_v8 }
 0x638   : > { %v1349_v11 = vld [vmem:[#allocation2] sm:$0xff] }
 0x639   : > { %v1358_v12 = vadd.f32 %v1638_v10, %v1349_v11 }
 0x63a   : > { %v1350_v13 = vld [vmem:[#allocation2 + $0x8] sm:$0xff] }
 0x63b   : > { %v1360_v14 = vadd.f32 %v1358_v12, %v2415_v3  ;;  %v1359_v15 = vadd.f32 %v1638_v10, %v1350_v13 }
 0x63d   : > { %v1362_v16 = vsel %vm490_vm0, %v1360_v14, 0.0  ;;  %v1361_v17 = vadd.f32 %v1359_v15, %v2417_v4 }
 0x63e   : > { %1363 = vadd.xlane.f32.xlu0 %v1362_v16 }
 0x63f   : > { %v1365_v18 = vsel %vm490_vm0, %v1361_v17, 0.0 }
 0x640   : > { %1366 = vadd.xlane.f32.xlu1 %v1365_v18 }
 0x6cb   : > { %v1364_v19 = vpop.xlane.xlu0 %1363 }
 0x6cc   : > { %v1369_v20 = vmul.f32 0.03125, %v1364_v19 }
 0x6cd   : > { %v1367_v21 = vpop.xlane.xlu1 %1366 }
 0x6ce   : > { %v1371_v22 = vsub.f32 %v1360_v14, %v1369_v20  ;;  %v1370_v23 = vmul.f32 0.03125, %v1367_v21 }
 0x6d0   : > { %v1372_v24 = vsub.f32 %v1361_v17, %v1370_v23  ;;  %v1373_v25 = vmul.f32 %v1371_v22, %v1371_v22 }
 0x6d2   : > { %v1375_v26 = vsel %vm490_vm0, %v1373_v25, 0.0  ;;  %v1374_v3 = vmul.f32 %v1372_v24, %v1372_v24 }
 0x6d3   : > { %1376 = vadd.xlane.f32.xlu0 %v1375_v26 }
 0x6d4   : > { %v1378_v27 = vsel %vm490_vm0, %v1374_v3, 0.0 }
 0x6d7   : > { %1379 = vadd.xlane.f32.xlu0 %v1378_v27 }
 0x760   : > { %v1377_v4 = vpop.xlane.xlu0 %1376 }
 0x761   : > { %v1381_v28 = vmul.f32 0.03125, %v1377_v4 }
 0x763   : > { %v1383_v29 = vadd.f32 1e-05, %v1381_v28 }
 0x764   : > { %v1380_v30 = vpop.xlane.xlu0 %1379 }
 0x765   : > { %1928 = vrsqrt.f32 %v1383_v29  ;;  %v1382_v31 = vmul.f32 0.03125, %v1380_v30 }
 0x767   : > { %v1384_v32 = vadd.f32 1e-05, %v1382_v31 }
 0x769   : > { %1930 = vrsqrt.f32 %v1384_v32 }
 0x76f   : > { %v1929_v33 = vpop.eup %1928 }
 0x770   : > { %v1387_v35 = vmul.f32 %v1929_v33, %v1371_v22 }
 0x772   : > { %v1396_v37 = vmul.f32 %v1639_v34, %v1387_v35 }
 0x773   : > { %v1931_v38 = vpop.eup %1930 }
 0x774   : > { %v1405_v39 = vadd.f32 %v1640_v36, %v1396_v37  ;;  %v1388_v40 = vmul.f32 %v1931_v38, %v1372_v24 }
 0x776   : > { %v1397_v41 = vmul.f32 %v1639_v34, %v1388_v40  ;;  %1407 = vst.msk [vmem:[%s469_s11] sm:$0xff] %vm490_vm0, %v1405_v39 }
 0x778   : > { %v1406_v42 = vadd.f32 %v1640_v36, %v1397_v41 }
 0x77a   : > { %1408 = vst.msk [vmem:[%s469_s11 + $0x8] sm:$0xff] %vm490_vm0, %v1406_v42 }
 0x77b   : > { %2033 = shalt.err (!%p2030_p12)
}
 0x77c   : > { %s2034_s18 = scalar_lea.hbm %s2573_s30, 256  ;;  %s2038_s26 = scalar_lea.hbm %s2667_s4, 512 }
 0x77d   : > { %p2035_p11 = scmp.ne.s32.totalorder %s2573_s30, %s2034_s18  ;;  %p2039_p13 = scmp.lt.u32.totalorder %s2573_s30, %s2667_s4 }
 0x77e   : > { %p2040_p0 = scmp.lt.u32.totalorder %s2038_s26, %s2034_s18  ;;  %p2042_p9 = scmp.lt.u32.totalorder %s2034_s18, %s2573_s30 }
 0x77f   : > { %p2036_p3 = pnand %p2035_p11, %p2269_p10 }
 0x780   : > { %p2041_p5 = por %p2040_p0, %p2039_p13 }
 0x781   : > { %p2037_p6 = pneg %p2036_p3 }
 0x782   : > { %p2043_p1 = por %p2042_p9, %p2041_p5 }
 0x784   : > { %p2044_p2 = pnand %p2043_p1, %p2037_p6 }
 0x786   : > { %2047 = shalt.err (!%p2044_p2)
}
 0x787   : > { %s2125_s16 = smov 128   ;;  %s2126_s21 = smov 8  }
 0x788   : > { %1784 = dma.vmem_to_hbm [thread:$0]  (%p2269_p10), %s2575_s24, 256, %s2573_s30, %s1410_s17, %s2125_s16, %s2125_s16, %s2126_s21  }
 0x789 PF: > { %s2668_s11 = sld [smem:[#allocation14_spill]]  ;;  %s2669_s23 = sld [smem:[#allocation16_spill]] }
 0x78a   : > { %p2671_p4 = scmp.ge.s32.totalorder %s2110_s14, 2 }
 0x78f   : > { %s1438_s25 = sand.u32 1, %s2668_s11   ;;  %p2670_p7 = scmp.ne.s32.totalorder %s2669_s23, 0 }
 0x790   : > { %s1439_s12 = scalar_lea.sflag [#allocation5], %s1438_s25 }
 0x791   : > { %p1798_p8 = pnand %p2671_p4, %p2670_p7 }
 0x793   : > { %2085 = dma.done.wait (!%p1798_p8), %s1439_s12, 256  }
 0x794   : > { %2087 = vsyncadd (!%p1798_p8), %s1439_s12, 4294967040  ;;  %s28_s14 = sadd.s32 1, %s2110_s14   ;;  %s2672_s15 = sld [smem:[#allocation15_spill]] }
 0x795   : > { %p25_p12 = scmp.ge.s32.totalorder %s28_s14, 4   ;;  %s2673_s11 = sld [smem:[#allocation18_spill]] }
 0x796   : > { %s2674_s22 = sld [smem:[#allocation17_spill]]  ;;  %s2675_s30 = smov %s2094_s10 }
 0x797   : > { %s2677_s12 = smov %s2106_s13  ;;  %27 = sbr.rel (!%p25_p12) target bundleno = 12 (0xc), region = 140 }
 0x79a   : > { %s2676_s10 = smov %s2672_s15 }
 0x79c   : > { %s2678_s13 = smov %s2674_s22 }
 0x79e   :  { %1444 = vsyncpa [#allocation4], 1 }
 0x79f   :  { %1446 = vsyncpa [#allocation4 + $0x1], 1 }
 0x7a0   :  { %1447 = vsyncpa [#allocation7], 1 }
 0x7a1   :  { %1449 = vsyncpa [#allocation7 + $0x1], 1 }
 0x7a2   :  { %1450 = vsyncpa [#allocation5], 1 }
 0x7a3   :  { %1452 = vsyncpa [#allocation5 + $0x1], 1 }

</bundles_post_ra>
